<compile_context>
chip_gen: v6e
topology: v6e:2x2x1
jax: 0.10.0
libtpu: 0.0.40
codegen_flags: <defaults>
</compile_context>

<pallas_src>
import math

import jax
import jax.numpy as jnp
from jax.experimental import pallas as pl
from jax.experimental.pallas import tpu as pltpu

INPUT_SIZE = 1
HIDDEN_SIZES = [128, 128, 128, 128]
HIDDEN = HIDDEN_SIZES[0]
OUTPUT_SIZE = 256
N_LAYERS = len(HIDDEN_SIZES) + 1  # 4 hidden + 1 output layer per MLP

_SQRT_2 = math.sqrt(2.0)
_VMEM_LIMIT = 32 * 1024 * 1024  # explicit scoped-VMEM cap (ample headroom)


def _erf_f32(x):
    # Eigen/XLA single-precision erf rational approximation (the same family
    # torch / XLA use for exact GELU); accurate to f32 ulps.
    x = jnp.clip(x, -4.0, 4.0)
    x2 = x * x
    p = x2 * (-2.72614225801306e-10) + 2.77068142495902e-08
    p = x2 * p + (-2.10102402082508e-06)
    p = x2 * p + (-5.69250639462346e-05)
    p = x2 * p + (-7.34990630326855e-04)
    p = x2 * p + (-2.95459980854025e-03)
    p = x2 * p + (-1.60960333262415e-02)
    p = x * p
    q = x2 * (-1.45660718464996e-05) + (-2.13374055278905e-04)
    q = x2 * q + (-1.68282697438203e-03)
    q = x2 * q + (-7.37332916720468e-03)
    q = x2 * q + (-1.42647390514189e-02)
    # EUP approximate reciprocal + one Newton-Raphson step: keeps the divide
    # off the saturated VALU slot while restoring ~2^-24 relative accuracy.
    r = pl.reciprocal(q, approx=True)
    r = r * (2.0 - q * r)
    return p * r


def _gelu_exact(x):
    # nn.GELU() default (approximate='none'): 0.5 * x * (1 + erf(x / sqrt(2)))
    return 0.5 * x * (1.0 + _erf_f32(x * (1.0 / _SQRT_2)))


# --------------------------------------------------------------------------
# Phase 1a: MLP1 over row tiles of x (batch-major layout) -> m1 (Nx, 256)
# --------------------------------------------------------------------------
def _mlp_rows_kernel(x_ref, w0_ref, b0_ref, w1_ref, b1_ref, w2_ref, b2_ref,
                     w3_ref, b3_ref, wo_ref, bo_ref, m_ref):
    # Layer 0 is a K=1 matmul: broadcast outer product on the VPU.
    h = _gelu_exact(x_ref[...] * w0_ref[...] + b0_ref[...])           # (TM, 128)
    for w_ref, b_ref in ((w1_ref, b1_ref), (w2_ref, b2_ref), (w3_ref, b3_ref)):
        h = _gelu_exact(
            jnp.dot(h, w_ref[...], preferred_element_type=jnp.float32)
            + b_ref[...])
    m_ref[...] = (jnp.dot(h, wo_ref[...], preferred_element_type=jnp.float32)
                  + bo_ref[...])                                       # (TM, 256)


# --------------------------------------------------------------------------
# Phase 1b: MLP2 over lane-dense column tiles of y (transposed layout)
#           -> m2^T (256, Ny).  Weights are pre-transposed host-side.
# --------------------------------------------------------------------------
def _mlp_cols_kernel(y_ref, w0_ref, b0_ref, w1_ref, b1_ref, w2_ref, b2_ref,
                     w3_ref, b3_ref, wo_ref, bo_ref, mt_ref):
    # y_ref: (1, TN) lane-dense; w0_ref: (128, 1); biases are column vectors.
    h = _gelu_exact(w0_ref[...] * y_ref[...] + b0_ref[...])            # (128, TN)
    for w_ref, b_ref in ((w1_ref, b1_ref), (w2_ref, b2_ref), (w3_ref, b3_ref)):
        h = _gelu_exact(
            jnp.dot(w_ref[...], h, preferred_element_type=jnp.float32)
            + b_ref[...])
    mt_ref[...] = (jnp.dot(wo_ref[...], h, preferred_element_type=jnp.float32)
                   + bo_ref[...])                                      # (256, TN)


# --------------------------------------------------------------------------
# Phase 2: u = m1 @ m2^T over (i, j) tiles (m2 already transposed, so this is
# the MXU-native NN matmul; K = 256 fits in one block, no reduction axis).
# --------------------------------------------------------------------------
def _outer_kernel(m1_ref, m2t_ref, o_ref):
    # TODO(synk): optionally cast m1/m2t tiles to bf16 here for the headline
    # MXU rate on v6e/v7x if the 1e-4 exact-erf tolerance can be relaxed.
    o_ref[...] = jnp.dot(m1_ref[...], m2t_ref[...],
                         preferred_element_type=jnp.float32)


def _round_up(a, b):
    return (a + b - 1) // b * b


def _mlp_rows(x_p, params, tm):
    nxp = x_p.shape[0]
    w_specs = [pl.BlockSpec(p.shape, lambda i: (0, 0)) for p in params]
    return pl.pallas_call(
        _mlp_rows_kernel,
        out_shape=jax.ShapeDtypeStruct((nxp, OUTPUT_SIZE), jnp.float32),
        grid=(nxp // tm,),
        # x tile is (TM, 1); its lane padding is <=128 KiB per (double-)buffer
        # at TM=512, negligible once tiled.
        in_specs=[pl.BlockSpec((tm, 1), lambda i: (i, 0))] + w_specs,
        out_specs=pl.BlockSpec((tm, OUTPUT_SIZE), lambda i: (i, 0)),
        compiler_params=pltpu.CompilerParams(
            dimension_semantics=("parallel",),
            vmem_limit_bytes=_VMEM_LIMIT),
    )(x_p, *params)


def _mlp_cols(y_row, params_t, tn):
    nyp = y_row.shape[1]
    w_specs = [pl.BlockSpec(p.shape, lambda j: (0, 0)) for p in params_t]
    return pl.pallas_call(
        _mlp_cols_kernel,
        out_shape=jax.ShapeDtypeStruct((OUTPUT_SIZE, nyp), jnp.float32),
        grid=(nyp // tn,),
        in_specs=[pl.BlockSpec((1, tn), lambda j: (0, j))] + w_specs,
        out_specs=pl.BlockSpec((OUTPUT_SIZE, tn), lambda j: (0, j)),
        compiler_params=pltpu.CompilerParams(
            dimension_semantics=("parallel",),
            vmem_limit_bytes=_VMEM_LIMIT),
    )(y_row, *params_t)


def _outer_product(m1, m2t, tm, tn):
    nxp, nyp = m1.shape[0], m2t.shape[1]
    return pl.pallas_call(
        _outer_kernel,
        out_shape=jax.ShapeDtypeStruct((nxp, nyp), jnp.float32),
        grid=(nxp // tm, nyp // tn),
        in_specs=[pl.BlockSpec((tm, OUTPUT_SIZE), lambda i, j: (i, 0)),
                  pl.BlockSpec((OUTPUT_SIZE, tn), lambda i, j: (0, j))],
        out_specs=pl.BlockSpec((tm, tn), lambda i, j: (i, j)),
        compiler_params=pltpu.CompilerParams(
            # Both output axes independent: lets v7x shard across its 2 TCs.
            dimension_semantics=("parallel", "parallel"),
            vmem_limit_bytes=_VMEM_LIMIT),
    )(m1, m2t)


def combined_forward(x, y, params1, params2, *, tm=512, tn=1024):
    """x: (Nx, 1), y: (Ny, 1); params*: flat [w0, b0, ..., w4, b4].

    Weights are (in_features, out_features) == torch W.T; biases are (1, out).
    Tile caps (tm<=512, tn<=1024) keep the phase-2 working set small enough
    for v7x's 64 MiB VMEM while staying lane-dense and MXU-aligned.
    """
    nx, ny = x.shape[0], y.shape[0]

    # Lane-dense, aligned tiles: TM multiple of 8, TN multiple of 128.
    tm = min(tm, _round_up(max(nx, 8), 8))
    tn = min(tn, _round_up(max(ny, 128), 128))
    nxp, nyp = _round_up(nx, tm), _round_up(ny, tn)

    x_p = jnp.pad(x.astype(jnp.float32), ((0, nxp - nx), (0, 0)))
    # Lane-dense y: a (1, Nyp) row vector instead of a 99%-lane-padded (Ny, 1).
    y_row = jnp.pad(jnp.reshape(y.astype(jnp.float32), (1, ny)),
                    ((0, 0), (0, nyp - ny)))

    # MLP2 runs in transposed (feature-major) layout -> transpose its weights
    # host-side (one-time cost); biases become column vectors.
    params2_t = []
    for l in range(N_LAYERS):
        params2_t += [params2[2 * l].T,
                      jnp.reshape(params2[2 * l + 1], (-1, 1))]

    m1 = _mlp_rows(x_p, params1, tm)        # (Nxp, 256)
    m2t = _mlp_cols(y_row, params2_t, tn)   # (256, Nyp)
    u = _outer_product(m1, m2t, tm, tn)     # (Nxp, Nyp)
    return u[:nx, :ny]


def _init_mlp_params(key):
    """Deterministic init mimicking torch.nn.Linear (uniform +-1/sqrt(fan_in)).

    Weights are stored (in_features, out_features) == W_torch.T; biases (1, out).
    """
    sizes = [INPUT_SIZE] + HIDDEN_SIZES + [OUTPUT_SIZE]
    params = []
    for i in range(N_LAYERS):
        fan_in, fan_out = sizes[i], sizes[i + 1]
        key, kw, kb = jax.random.split(key, 3)
        bound = 1.0 / math.sqrt(fan_in)
        w = jax.random.uniform(kw, (fan_in, fan_out), jnp.float32, -bound, bound)
        b = jax.random.uniform(kb, (1, fan_out), jnp.float32, -bound, bound)
        params += [w, b]
    return params, key


def _reference_forward(x, y, params1, params2):
    # Pure-JAX reference (exact GELU via jax.scipy erf) for correctness check.
    def mlp(h, p):
        for i in range(N_LAYERS):
            h = h @ p[2 * i] + p[2 * i + 1]
            if i < N_LAYERS - 1:
                h = 0.5 * h * (1.0 + jax.scipy.special.erf(h / _SQRT_2))
        return h
    return mlp(x, params1) @ mlp(y, params2).T


if __name__ == "__main__":
    key = jax.random.PRNGKey(0)
    params1, key = _init_mlp_params(key)
    params2, key = _init_mlp_params(key)

    # Small shapes that still exercise multi-step grids, padding and slicing.
    Nx, Ny = 40, 272
    key, kx, ky = jax.random.split(key, 3)
    x = jax.random.normal(kx, (Nx, INPUT_SIZE), jnp.float32)
    y = jax.random.normal(ky, (Ny, INPUT_SIZE), jnp.float32)

    u = combined_forward(x, y, params1, params2, tm=16, tn=128)
    u = jax.block_until_ready(u)

    u_ref = _reference_forward(x, y, params1, params2)
    assert u.shape == (Nx, Ny)
    assert jnp.allclose(u, u_ref, rtol=1e-4, atol=1e-4), (
        float(jnp.max(jnp.abs(u - u_ref))))

    print("KERNEL_OK")
</pallas_src>

<mosaic_0001>
module attributes {stable_mosaic.version = 11 : i64} {
  func.func @_mlp_rows_kernel(%arg0: i32, %arg1: memref<16x1xf32, #tpu.memory_space<vmem>>, %arg2: memref<1x128xf32, #tpu.memory_space<vmem>>, %arg3: memref<1x128xf32, #tpu.memory_space<vmem>>, %arg4: memref<128x128xf32, #tpu.memory_space<vmem>>, %arg5: memref<1x128xf32, #tpu.memory_space<vmem>>, %arg6: memref<128x128xf32, #tpu.memory_space<vmem>>, %arg7: memref<1x128xf32, #tpu.memory_space<vmem>>, %arg8: memref<128x128xf32, #tpu.memory_space<vmem>>, %arg9: memref<1x128xf32, #tpu.memory_space<vmem>>, %arg10: memref<128x256xf32, #tpu.memory_space<vmem>>, %arg11: memref<1x256xf32, #tpu.memory_space<vmem>>, %arg12: memref<16x256xf32, #tpu.memory_space<vmem>>) attributes {dimension_semantics = [#tpu.dimension_semantics<parallel>], iteration_bounds = array<i64: 3>, scalar_prefetch = 0 : i64, scratch_operands = 0 : i64, tpu.core_type = #tpu.core_type<tc>, window_params = [{transform_indices = @transform_0, window_bounds = array<i64: 16, 1>}, {pipeline_mode = #tpu.pipeline_mode<synchronous>, transform_indices = @transform_1, window_bounds = array<i64: 1, 128>}, {pipeline_mode = #tpu.pipeline_mode<synchronous>, transform_indices = @transform_2, window_bounds = array<i64: 1, 128>}, {pipeline_mode = #tpu.pipeline_mode<synchronous>, transform_indices = @transform_3, window_bounds = array<i64: 128, 128>}, {pipeline_mode = #tpu.pipeline_mode<synchronous>, transform_indices = @transform_4, window_bounds = array<i64: 1, 128>}, {pipeline_mode = #tpu.pipeline_mode<synchronous>, transform_indices = @transform_5, window_bounds = array<i64: 128, 128>}, {pipeline_mode = #tpu.pipeline_mode<synchronous>, transform_indices = @transform_6, window_bounds = array<i64: 1, 128>}, {pipeline_mode = #tpu.pipeline_mode<synchronous>, transform_indices = @transform_7, window_bounds = array<i64: 128, 128>}, {pipeline_mode = #tpu.pipeline_mode<synchronous>, transform_indices = @transform_8, window_bounds = array<i64: 1, 128>}, {pipeline_mode = #tpu.pipeline_mode<synchronous>, transform_indices = @transform_9, window_bounds = array<i64: 128, 256>}, {pipeline_mode = #tpu.pipeline_mode<synchronous>, transform_indices = @transform_10, window_bounds = array<i64: 1, 256>}, {transform_indices = @transform_11, window_bounds = array<i64: 16, 256>}]} {
    %c0 = arith.constant 0 : index
    %c0_0 = arith.constant 0 : index
    %0 = vector.load %arg1[%c0, %c0_0] : memref<16x1xf32, #tpu.memory_space<vmem>>, vector<16x1xf32>
    %c0_1 = arith.constant 0 : index
    %c0_2 = arith.constant 0 : index
    %1 = vector.load %arg2[%c0_1, %c0_2] : memref<1x128xf32, #tpu.memory_space<vmem>>, vector<1x128xf32>
    %2 = vector.broadcast %0 : vector<16x1xf32> to vector<16x128xf32>
    %3 = vector.broadcast %1 : vector<1x128xf32> to vector<16x128xf32>
    %4 = arith.mulf %2, %3 : vector<16x128xf32>
    %c0_3 = arith.constant 0 : index
    %c0_4 = arith.constant 0 : index
    %5 = vector.load %arg3[%c0_3, %c0_4] : memref<1x128xf32, #tpu.memory_space<vmem>>, vector<1x128xf32>
    %6 = vector.broadcast %5 : vector<1x128xf32> to vector<16x128xf32>
    %7 = arith.addf %4, %6 : vector<16x128xf32>
    %cst = arith.constant 5.000000e-01 : f32
    %8 = vector.broadcast %cst : f32 to vector<16x128xf32>
    %9 = arith.mulf %8, %7 : vector<16x128xf32>
    %cst_5 = arith.constant 0.707106769 : f32
    %10 = vector.broadcast %cst_5 : f32 to vector<16x128xf32>
    %11 = arith.mulf %7, %10 : vector<16x128xf32>
    %cst_6 = arith.constant -4.000000e+00 : f32
    %cst_7 = arith.constant 4.000000e+00 : f32
    %12 = vector.broadcast %cst_6 : f32 to vector<16x128xf32>
    %13 = arith.maximumf %12, %11 : vector<16x128xf32>
    %14 = vector.broadcast %cst_7 : f32 to vector<16x128xf32>
    %15 = arith.minimumf %14, %13 : vector<16x128xf32>
    %16 = arith.mulf %15, %15 : vector<16x128xf32>
    %cst_8 = arith.constant -2.72614237E-10 : f32
    %17 = vector.broadcast %cst_8 : f32 to vector<16x128xf32>
    %18 = arith.mulf %16, %17 : vector<16x128xf32>
    %cst_9 = arith.constant 2.77068146E-8 : f32
    %19 = vector.broadcast %cst_9 : f32 to vector<16x128xf32>
    %20 = arith.addf %18, %19 : vector<16x128xf32>
    %21 = arith.mulf %16, %20 : vector<16x128xf32>
    %cst_10 = arith.constant -2.10102394E-6 : f32
    %22 = vector.broadcast %cst_10 : f32 to vector<16x128xf32>
    %23 = arith.addf %21, %22 : vector<16x128xf32>
    %24 = arith.mulf %16, %23 : vector<16x128xf32>
    %cst_11 = arith.constant -5.69250624E-5 : f32
    %25 = vector.broadcast %cst_11 : f32 to vector<16x128xf32>
    %26 = arith.addf %24, %25 : vector<16x128xf32>
    %27 = arith.mulf %16, %26 : vector<16x128xf32>
    %cst_12 = arith.constant -7.34990637E-4 : f32
    %28 = vector.broadcast %cst_12 : f32 to vector<16x128xf32>
    %29 = arith.addf %27, %28 : vector<16x128xf32>
    %30 = arith.mulf %16, %29 : vector<16x128xf32>
    %cst_13 = arith.constant -2.954600e-03 : f32
    %31 = vector.broadcast %cst_13 : f32 to vector<16x128xf32>
    %32 = arith.addf %30, %31 : vector<16x128xf32>
    %33 = arith.mulf %16, %32 : vector<16x128xf32>
    %cst_14 = arith.constant -0.0160960332 : f32
    %34 = vector.broadcast %cst_14 : f32 to vector<16x128xf32>
    %35 = arith.addf %33, %34 : vector<16x128xf32>
    %36 = arith.mulf %15, %35 : vector<16x128xf32>
    %cst_15 = arith.constant -1.45660715E-5 : f32
    %37 = vector.broadcast %cst_15 : f32 to vector<16x128xf32>
    %38 = arith.mulf %16, %37 : vector<16x128xf32>
    %cst_16 = arith.constant -2.13374049E-4 : f32
    %39 = vector.broadcast %cst_16 : f32 to vector<16x128xf32>
    %40 = arith.addf %38, %39 : vector<16x128xf32>
    %41 = arith.mulf %16, %40 : vector<16x128xf32>
    %cst_17 = arith.constant -0.00168282702 : f32
    %42 = vector.broadcast %cst_17 : f32 to vector<16x128xf32>
    %43 = arith.addf %41, %42 : vector<16x128xf32>
    %44 = arith.mulf %16, %43 : vector<16x128xf32>
    %cst_18 = arith.constant -0.00737332925 : f32
    %45 = vector.broadcast %cst_18 : f32 to vector<16x128xf32>
    %46 = arith.addf %44, %45 : vector<16x128xf32>
    %47 = arith.mulf %16, %46 : vector<16x128xf32>
    %cst_19 = arith.constant -0.0142647391 : f32
    %48 = vector.broadcast %cst_19 : f32 to vector<16x128xf32>
    %49 = arith.addf %47, %48 : vector<16x128xf32>
    %50 = tpu.reciprocal %49 {approx = true} : vector<16x128xf32> -> vector<16x128xf32>
    %51 = arith.mulf %49, %50 : vector<16x128xf32>
    %cst_20 = arith.constant 2.000000e+00 : f32
    %52 = vector.broadcast %cst_20 : f32 to vector<16x128xf32>
    %53 = arith.subf %52, %51 : vector<16x128xf32>
    %54 = arith.mulf %50, %53 : vector<16x128xf32>
    %55 = arith.mulf %36, %54 : vector<16x128xf32>
    %cst_21 = arith.constant 1.000000e+00 : f32
    %56 = vector.broadcast %cst_21 : f32 to vector<16x128xf32>
    %57 = arith.addf %56, %55 : vector<16x128xf32>
    %58 = arith.mulf %9, %57 : vector<16x128xf32>
    %c0_22 = arith.constant 0 : index
    %c0_23 = arith.constant 0 : index
    %59 = vector.load %arg4[%c0_22, %c0_23] : memref<128x128xf32, #tpu.memory_space<vmem>>, vector<128x128xf32>
    %cst_24 = arith.constant dense<0.000000e+00> : vector<16x128xf32>
    %60 = tpu.matmul %58, %59, %cst_24 {dimension_numbers = #tpu.dot_dimension_numbers<[1], [0], [0], [1], [0, 0, 1, 1], [], []>} : vector<16x128xf32>, vector<128x128xf32>, vector<16x128xf32> -> vector<16x128xf32>
    %c0_25 = arith.constant 0 : index
    %c0_26 = arith.constant 0 : index
    %61 = vector.load %arg5[%c0_25, %c0_26] : memref<1x128xf32, #tpu.memory_space<vmem>>, vector<1x128xf32>
    %62 = vector.broadcast %61 : vector<1x128xf32> to vector<16x128xf32>
    %63 = arith.addf %60, %62 : vector<16x128xf32>
    %cst_27 = arith.constant 5.000000e-01 : f32
    %64 = vector.broadcast %cst_27 : f32 to vector<16x128xf32>
    %65 = arith.mulf %64, %63 : vector<16x128xf32>
    %cst_28 = arith.constant 0.707106769 : f32
    %66 = vector.broadcast %cst_28 : f32 to vector<16x128xf32>
    %67 = arith.mulf %63, %66 : vector<16x128xf32>
    %cst_29 = arith.constant -4.000000e+00 : f32
    %cst_30 = arith.constant 4.000000e+00 : f32
    %68 = vector.broadcast %cst_29 : f32 to vector<16x128xf32>
    %69 = arith.maximumf %68, %67 : vector<16x128xf32>
    %70 = vector.broadcast %cst_30 : f32 to vector<16x128xf32>
    %71 = arith.minimumf %70, %69 : vector<16x128xf32>
    %72 = arith.mulf %71, %71 : vector<16x128xf32>
    %cst_31 = arith.constant -2.72614237E-10 : f32
    %73 = vector.broadcast %cst_31 : f32 to vector<16x128xf32>
    %74 = arith.mulf %72, %73 : vector<16x128xf32>
    %cst_32 = arith.constant 2.77068146E-8 : f32
    %75 = vector.broadcast %cst_32 : f32 to vector<16x128xf32>
    %76 = arith.addf %74, %75 : vector<16x128xf32>
    %77 = arith.mulf %72, %76 : vector<16x128xf32>
    %cst_33 = arith.constant -2.10102394E-6 : f32
    %78 = vector.broadcast %cst_33 : f32 to vector<16x128xf32>
    %79 = arith.addf %77, %78 : vector<16x128xf32>
    %80 = arith.mulf %72, %79 : vector<16x128xf32>
    %cst_34 = arith.constant -5.69250624E-5 : f32
    %81 = vector.broadcast %cst_34 : f32 to vector<16x128xf32>
    %82 = arith.addf %80, %81 : vector<16x128xf32>
    %83 = arith.mulf %72, %82 : vector<16x128xf32>
    %cst_35 = arith.constant -7.34990637E-4 : f32
    %84 = vector.broadcast %cst_35 : f32 to vector<16x128xf32>
    %85 = arith.addf %83, %84 : vector<16x128xf32>
    %86 = arith.mulf %72, %85 : vector<16x128xf32>
    %cst_36 = arith.constant -2.954600e-03 : f32
    %87 = vector.broadcast %cst_36 : f32 to vector<16x128xf32>
    %88 = arith.addf %86, %87 : vector<16x128xf32>
    %89 = arith.mulf %72, %88 : vector<16x128xf32>
    %cst_37 = arith.constant -0.0160960332 : f32
    %90 = vector.broadcast %cst_37 : f32 to vector<16x128xf32>
    %91 = arith.addf %89, %90 : vector<16x128xf32>
    %92 = arith.mulf %71, %91 : vector<16x128xf32>
    %cst_38 = arith.constant -1.45660715E-5 : f32
    %93 = vector.broadcast %cst_38 : f32 to vector<16x128xf32>
    %94 = arith.mulf %72, %93 : vector<16x128xf32>
    %cst_39 = arith.constant -2.13374049E-4 : f32
    %95 = vector.broadcast %cst_39 : f32 to vector<16x128xf32>
    %96 = arith.addf %94, %95 : vector<16x128xf32>
    %97 = arith.mulf %72, %96 : vector<16x128xf32>
    %cst_40 = arith.constant -0.00168282702 : f32
    %98 = vector.broadcast %cst_40 : f32 to vector<16x128xf32>
    %99 = arith.addf %97, %98 : vector<16x128xf32>
    %100 = arith.mulf %72, %99 : vector<16x128xf32>
    %cst_41 = arith.constant -0.00737332925 : f32
    %101 = vector.broadcast %cst_41 : f32 to vector<16x128xf32>
    %102 = arith.addf %100, %101 : vector<16x128xf32>
    %103 = arith.mulf %72, %102 : vector<16x128xf32>
    %cst_42 = arith.constant -0.0142647391 : f32
    %104 = vector.broadcast %cst_42 : f32 to vector<16x128xf32>
    %105 = arith.addf %103, %104 : vector<16x128xf32>
    %106 = tpu.reciprocal %105 {approx = true} : vector<16x128xf32> -> vector<16x128xf32>
    %107 = arith.mulf %105, %106 : vector<16x128xf32>
    %cst_43 = arith.constant 2.000000e+00 : f32
    %108 = vector.broadcast %cst_43 : f32 to vector<16x128xf32>
    %109 = arith.subf %108, %107 : vector<16x128xf32>
    %110 = arith.mulf %106, %109 : vector<16x128xf32>
    %111 = arith.mulf %92, %110 : vector<16x128xf32>
    %cst_44 = arith.constant 1.000000e+00 : f32
    %112 = vector.broadcast %cst_44 : f32 to vector<16x128xf32>
    %113 = arith.addf %112, %111 : vector<16x128xf32>
    %114 = arith.mulf %65, %113 : vector<16x128xf32>
    %c0_45 = arith.constant 0 : index
    %c0_46 = arith.constant 0 : index
    %115 = vector.load %arg6[%c0_45, %c0_46] : memref<128x128xf32, #tpu.memory_space<vmem>>, vector<128x128xf32>
    %cst_47 = arith.constant dense<0.000000e+00> : vector<16x128xf32>
    %116 = tpu.matmul %114, %115, %cst_47 {dimension_numbers = #tpu.dot_dimension_numbers<[1], [0], [0], [1], [0, 0, 1, 1], [], []>} : vector<16x128xf32>, vector<128x128xf32>, vector<16x128xf32> -> vector<16x128xf32>
    %c0_48 = arith.constant 0 : index
    %c0_49 = arith.constant 0 : index
    %117 = vector.load %arg7[%c0_48, %c0_49] : memref<1x128xf32, #tpu.memory_space<vmem>>, vector<1x128xf32>
    %118 = vector.broadcast %117 : vector<1x128xf32> to vector<16x128xf32>
    %119 = arith.addf %116, %118 : vector<16x128xf32>
    %cst_50 = arith.constant 5.000000e-01 : f32
    %120 = vector.broadcast %cst_50 : f32 to vector<16x128xf32>
    %121 = arith.mulf %120, %119 : vector<16x128xf32>
    %cst_51 = arith.constant 0.707106769 : f32
    %122 = vector.broadcast %cst_51 : f32 to vector<16x128xf32>
    %123 = arith.mulf %119, %122 : vector<16x128xf32>
    %cst_52 = arith.constant -4.000000e+00 : f32
    %cst_53 = arith.constant 4.000000e+00 : f32
    %124 = vector.broadcast %cst_52 : f32 to vector<16x128xf32>
    %125 = arith.maximumf %124, %123 : vector<16x128xf32>
    %126 = vector.broadcast %cst_53 : f32 to vector<16x128xf32>
    %127 = arith.minimumf %126, %125 : vector<16x128xf32>
    %128 = arith.mulf %127, %127 : vector<16x128xf32>
    %cst_54 = arith.constant -2.72614237E-10 : f32
    %129 = vector.broadcast %cst_54 : f32 to vector<16x128xf32>
    %130 = arith.mulf %128, %129 : vector<16x128xf32>
    %cst_55 = arith.constant 2.77068146E-8 : f32
    %131 = vector.broadcast %cst_55 : f32 to vector<16x128xf32>
    %132 = arith.addf %130, %131 : vector<16x128xf32>
    %133 = arith.mulf %128, %132 : vector<16x128xf32>
    %cst_56 = arith.constant -2.10102394E-6 : f32
    %134 = vector.broadcast %cst_56 : f32 to vector<16x128xf32>
    %135 = arith.addf %133, %134 : vector<16x128xf32>
    %136 = arith.mulf %128, %135 : vector<16x128xf32>
    %cst_57 = arith.constant -5.69250624E-5 : f32
    %137 = vector.broadcast %cst_57 : f32 to vector<16x128xf32>
    %138 = arith.addf %136, %137 : vector<16x128xf32>
    %139 = arith.mulf %128, %138 : vector<16x128xf32>
    %cst_58 = arith.constant -7.34990637E-4 : f32
    %140 = vector.broadcast %cst_58 : f32 to vector<16x128xf32>
    %141 = arith.addf %139, %140 : vector<16x128xf32>
    %142 = arith.mulf %128, %141 : vector<16x128xf32>
    %cst_59 = arith.constant -2.954600e-03 : f32
    %143 = vector.broadcast %cst_59 : f32 to vector<16x128xf32>
    %144 = arith.addf %142, %143 : vector<16x128xf32>
    %145 = arith.mulf %128, %144 : vector<16x128xf32>
    %cst_60 = arith.constant -0.0160960332 : f32
    %146 = vector.broadcast %cst_60 : f32 to vector<16x128xf32>
    %147 = arith.addf %145, %146 : vector<16x128xf32>
    %148 = arith.mulf %127, %147 : vector<16x128xf32>
    %cst_61 = arith.constant -1.45660715E-5 : f32
    %149 = vector.broadcast %cst_61 : f32 to vector<16x128xf32>
    %150 = arith.mulf %128, %149 : vector<16x128xf32>
    %cst_62 = arith.constant -2.13374049E-4 : f32
    %151 = vector.broadcast %cst_62 : f32 to vector<16x128xf32>
    %152 = arith.addf %150, %151 : vector<16x128xf32>
    %153 = arith.mulf %128, %152 : vector<16x128xf32>
    %cst_63 = arith.constant -0.00168282702 : f32
    %154 = vector.broadcast %cst_63 : f32 to vector<16x128xf32>
    %155 = arith.addf %153, %154 : vector<16x128xf32>
    %156 = arith.mulf %128, %155 : vector<16x128xf32>
    %cst_64 = arith.constant -0.00737332925 : f32
    %157 = vector.broadcast %cst_64 : f32 to vector<16x128xf32>
    %158 = arith.addf %156, %157 : vector<16x128xf32>
    %159 = arith.mulf %128, %158 : vector<16x128xf32>
    %cst_65 = arith.constant -0.0142647391 : f32
    %160 = vector.broadcast %cst_65 : f32 to vector<16x128xf32>
    %161 = arith.addf %159, %160 : vector<16x128xf32>
    %162 = tpu.reciprocal %161 {approx = true} : vector<16x128xf32> -> vector<16x128xf32>
    %163 = arith.mulf %161, %162 : vector<16x128xf32>
    %cst_66 = arith.constant 2.000000e+00 : f32
    %164 = vector.broadcast %cst_66 : f32 to vector<16x128xf32>
    %165 = arith.subf %164, %163 : vector<16x128xf32>
    %166 = arith.mulf %162, %165 : vector<16x128xf32>
    %167 = arith.mulf %148, %166 : vector<16x128xf32>
    %cst_67 = arith.constant 1.000000e+00 : f32
    %168 = vector.broadcast %cst_67 : f32 to vector<16x128xf32>
    %169 = arith.addf %168, %167 : vector<16x128xf32>
    %170 = arith.mulf %121, %169 : vector<16x128xf32>
    %c0_68 = arith.constant 0 : index
    %c0_69 = arith.constant 0 : index
    %171 = vector.load %arg8[%c0_68, %c0_69] : memref<128x128xf32, #tpu.memory_space<vmem>>, vector<128x128xf32>
    %cst_70 = arith.constant dense<0.000000e+00> : vector<16x128xf32>
    %172 = tpu.matmul %170, %171, %cst_70 {dimension_numbers = #tpu.dot_dimension_numbers<[1], [0], [0], [1], [0, 0, 1, 1], [], []>} : vector<16x128xf32>, vector<128x128xf32>, vector<16x128xf32> -> vector<16x128xf32>
    %c0_71 = arith.constant 0 : index
    %c0_72 = arith.constant 0 : index
    %173 = vector.load %arg9[%c0_71, %c0_72] : memref<1x128xf32, #tpu.memory_space<vmem>>, vector<1x128xf32>
    %174 = vector.broadcast %173 : vector<1x128xf32> to vector<16x128xf32>
    %175 = arith.addf %172, %174 : vector<16x128xf32>
    %cst_73 = arith.constant 5.000000e-01 : f32
    %176 = vector.broadcast %cst_73 : f32 to vector<16x128xf32>
    %177 = arith.mulf %176, %175 : vector<16x128xf32>
    %cst_74 = arith.constant 0.707106769 : f32
    %178 = vector.broadcast %cst_74 : f32 to vector<16x128xf32>
    %179 = arith.mulf %175, %178 : vector<16x128xf32>
    %cst_75 = arith.constant -4.000000e+00 : f32
    %cst_76 = arith.constant 4.000000e+00 : f32
    %180 = vector.broadcast %cst_75 : f32 to vector<16x128xf32>
    %181 = arith.maximumf %180, %179 : vector<16x128xf32>
    %182 = vector.broadcast %cst_76 : f32 to vector<16x128xf32>
    %183 = arith.minimumf %182, %181 : vector<16x128xf32>
    %184 = arith.mulf %183, %183 : vector<16x128xf32>
    %cst_77 = arith.constant -2.72614237E-10 : f32
    %185 = vector.broadcast %cst_77 : f32 to vector<16x128xf32>
    %186 = arith.mulf %184, %185 : vector<16x128xf32>
    %cst_78 = arith.constant 2.77068146E-8 : f32
    %187 = vector.broadcast %cst_78 : f32 to vector<16x128xf32>
    %188 = arith.addf %186, %187 : vector<16x128xf32>
    %189 = arith.mulf %184, %188 : vector<16x128xf32>
    %cst_79 = arith.constant -2.10102394E-6 : f32
    %190 = vector.broadcast %cst_79 : f32 to vector<16x128xf32>
    %191 = arith.addf %189, %190 : vector<16x128xf32>
    %192 = arith.mulf %184, %191 : vector<16x128xf32>
    %cst_80 = arith.constant -5.69250624E-5 : f32
    %193 = vector.broadcast %cst_80 : f32 to vector<16x128xf32>
    %194 = arith.addf %192, %193 : vector<16x128xf32>
    %195 = arith.mulf %184, %194 : vector<16x128xf32>
    %cst_81 = arith.constant -7.34990637E-4 : f32
    %196 = vector.broadcast %cst_81 : f32 to vector<16x128xf32>
    %197 = arith.addf %195, %196 : vector<16x128xf32>
    %198 = arith.mulf %184, %197 : vector<16x128xf32>
    %cst_82 = arith.constant -2.954600e-03 : f32
    %199 = vector.broadcast %cst_82 : f32 to vector<16x128xf32>
    %200 = arith.addf %198, %199 : vector<16x128xf32>
    %201 = arith.mulf %184, %200 : vector<16x128xf32>
    %cst_83 = arith.constant -0.0160960332 : f32
    %202 = vector.broadcast %cst_83 : f32 to vector<16x128xf32>
    %203 = arith.addf %201, %202 : vector<16x128xf32>
    %204 = arith.mulf %183, %203 : vector<16x128xf32>
    %cst_84 = arith.constant -1.45660715E-5 : f32
    %205 = vector.broadcast %cst_84 : f32 to vector<16x128xf32>
    %206 = arith.mulf %184, %205 : vector<16x128xf32>
    %cst_85 = arith.constant -2.13374049E-4 : f32
    %207 = vector.broadcast %cst_85 : f32 to vector<16x128xf32>
    %208 = arith.addf %206, %207 : vector<16x128xf32>
    %209 = arith.mulf %184, %208 : vector<16x128xf32>
    %cst_86 = arith.constant -0.00168282702 : f32
    %210 = vector.broadcast %cst_86 : f32 to vector<16x128xf32>
    %211 = arith.addf %209, %210 : vector<16x128xf32>
    %212 = arith.mulf %184, %211 : vector<16x128xf32>
    %cst_87 = arith.constant -0.00737332925 : f32
    %213 = vector.broadcast %cst_87 : f32 to vector<16x128xf32>
    %214 = arith.addf %212, %213 : vector<16x128xf32>
    %215 = arith.mulf %184, %214 : vector<16x128xf32>
    %cst_88 = arith.constant -0.0142647391 : f32
    %216 = vector.broadcast %cst_88 : f32 to vector<16x128xf32>
    %217 = arith.addf %215, %216 : vector<16x128xf32>
    %218 = tpu.reciprocal %217 {approx = true} : vector<16x128xf32> -> vector<16x128xf32>
    %219 = arith.mulf %217, %218 : vector<16x128xf32>
    %cst_89 = arith.constant 2.000000e+00 : f32
    %220 = vector.broadcast %cst_89 : f32 to vector<16x128xf32>
    %221 = arith.subf %220, %219 : vector<16x128xf32>
    %222 = arith.mulf %218, %221 : vector<16x128xf32>
    %223 = arith.mulf %204, %222 : vector<16x128xf32>
    %cst_90 = arith.constant 1.000000e+00 : f32
    %224 = vector.broadcast %cst_90 : f32 to vector<16x128xf32>
    %225 = arith.addf %224, %223 : vector<16x128xf32>
    %226 = arith.mulf %177, %225 : vector<16x128xf32>
    %c0_91 = arith.constant 0 : index
    %c0_92 = arith.constant 0 : index
    %227 = vector.load %arg10[%c0_91, %c0_92] : memref<128x256xf32, #tpu.memory_space<vmem>>, vector<128x256xf32>
    %cst_93 = arith.constant dense<0.000000e+00> : vector<16x256xf32>
    %228 = tpu.matmul %226, %227, %cst_93 {dimension_numbers = #tpu.dot_dimension_numbers<[1], [0], [0], [1], [0, 0, 1, 1], [], []>} : vector<16x128xf32>, vector<128x256xf32>, vector<16x256xf32> -> vector<16x256xf32>
    %c0_94 = arith.constant 0 : index
    %c0_95 = arith.constant 0 : index
    %229 = vector.load %arg11[%c0_94, %c0_95] : memref<1x256xf32, #tpu.memory_space<vmem>>, vector<1x256xf32>
    %230 = vector.broadcast %229 : vector<1x256xf32> to vector<16x256xf32>
    %231 = arith.addf %228, %230 : vector<16x256xf32>
    %c0_96 = arith.constant 0 : index
    %c0_97 = arith.constant 0 : index
    %232 = vector.load %arg12[%c0_96, %c0_97] : memref<16x256xf32, #tpu.memory_space<vmem>>, vector<16x256xf32>
    tpu.vector_store %arg12[%c0_96, %c0_97], %231 {strides = array<i32>} : memref<16x256xf32, #tpu.memory_space<vmem>>, vector<16x256xf32>,
    return
  }
  func.func @transform_0(%arg0: i32) -> (i32, i32) {
    %c0_i32 = arith.constant 0 : i32
    %c0_i32_0 = arith.constant 0 : i32
    return %arg0, %c0_i32 : i32, i32
  }
  func.func @transform_1(%arg0: i32) -> (i32, i32) {
    %c0_i32 = arith.constant 0 : i32
    %c0_i32_0 = arith.constant 0 : i32
    %c0_i32_1 = arith.constant 0 : i32
    return %c0_i32, %c0_i32_0 : i32, i32
  }
  func.func @transform_2(%arg0: i32) -> (i32, i32) {
    %c0_i32 = arith.constant 0 : i32
    %c0_i32_0 = arith.constant 0 : i32
    %c0_i32_1 = arith.constant 0 : i32
    return %c0_i32, %c0_i32_0 : i32, i32
  }
  func.func @transform_3(%arg0: i32) -> (i32, i32) {
    %c0_i32 = arith.constant 0 : i32
    %c0_i32_0 = arith.constant 0 : i32
    %c0_i32_1 = arith.constant 0 : i32
    return %c0_i32, %c0_i32_0 : i32, i32
  }
  func.func @transform_4(%arg0: i32) -> (i32, i32) {
    %c0_i32 = arith.constant 0 : i32
    %c0_i32_0 = arith.constant 0 : i32
    %c0_i32_1 = arith.constant 0 : i32
    return %c0_i32, %c0_i32_0 : i32, i32
  }
  func.func @transform_5(%arg0: i32) -> (i32, i32) {
    %c0_i32 = arith.constant 0 : i32
    %c0_i32_0 = arith.constant 0 : i32
    %c0_i32_1 = arith.constant 0 : i32
    return %c0_i32, %c0_i32_0 : i32, i32
  }
  func.func @transform_6(%arg0: i32) -> (i32, i32) {
    %c0_i32 = arith.constant 0 : i32
    %c0_i32_0 = arith.constant 0 : i32
    %c0_i32_1 = arith.constant 0 : i32
    return %c0_i32, %c0_i32_0 : i32, i32
  }
  func.func @transform_7(%arg0: i32) -> (i32, i32) {
    %c0_i32 = arith.constant 0 : i32
    %c0_i32_0 = arith.constant 0 : i32
    %c0_i32_1 = arith.constant 0 : i32
    return %c0_i32, %c0_i32_0 : i32, i32
  }
  func.func @transform_8(%arg0: i32) -> (i32, i32) {
    %c0_i32 = arith.constant 0 : i32
    %c0_i32_0 = arith.constant 0 : i32
    %c0_i32_1 = arith.constant 0 : i32
    return %c0_i32, %c0_i32_0 : i32, i32
  }
  func.func @transform_9(%arg0: i32) -> (i32, i32) {
    %c0_i32 = arith.constant 0 : i32
    %c0_i32_0 = arith.constant 0 : i32
    %c0_i32_1 = arith.constant 0 : i32
    return %c0_i32, %c0_i32_0 : i32, i32
  }
  func.func @transform_10(%arg0: i32) -> (i32, i32) {
    %c0_i32 = arith.constant 0 : i32
    %c0_i32_0 = arith.constant 0 : i32
    %c0_i32_1 = arith.constant 0 : i32
    return %c0_i32, %c0_i32_0 : i32, i32
  }
  func.func @transform_11(%arg0: i32) -> (i32, i32) {
    %c0_i32 = arith.constant 0 : i32
    %c0_i32_0 = arith.constant 0 : i32
    return %arg0, %c0_i32 : i32, i32
  }
}

</mosaic_0001>

<bundles_post_ra>
// kernel: tpu_custom_call.1
= control target key start
LH: loop header
LB: loop body
LE: loop exit
PB: predicated region body
PF: predicated region fallthrough
CT: control target
= control target key end

     0   :  { %16 = vsyncpa [#allocation3], 0  ;;  %s2023_s0 = inlined_call_operand.vmem [shape: f32[48,1], index: 0, kind: input, shape index: {}]   ;;  %s2024_s1 = inlined_call_operand.vmem [shape: f32[1,128], index: 1, kind: input, shape index: {}]   ;;  %s2025_s2 = inlined_call_operand.vmem [shape: f32[1,128], index: 2, kind: input, shape index: {}]   ;;  %s2026_s3 = inlined_call_operand.hbm [shape: f32[128,128], index: 3, kind: input, shape index: {}]   ;;  %s2027_s4 = inlined_call_operand.vmem [shape: f32[1,128], index: 4, kind: input, shape index: {}]   ;;  %s2028_s5 = inlined_call_operand.hbm [shape: f32[128,128], index: 5, kind: input, shape index: {}]   ;;  %s2029_s6 = inlined_call_operand.vmem [shape: f32[1,128], index: 6, kind: input, shape index: {}]   ;;  %s2030_s7 = inlined_call_operand.hbm [shape: f32[128,128], index: 7, kind: input, shape index: {}]   ;;  %s2031_s8 = inlined_call_operand.vmem [shape: f32[1,128], index: 8, kind: input, shape index: {}]   ;;  %s2032_s9 = inlined_call_operand.hbm [shape: f32[128,256], index: 9, kind: input, shape index: {}]   ;;  %s2033_s10 = inlined_call_operand.vmem [shape: f32[1,256], index: 10, kind: input, shape index: {}]   ;;  %s2034_s11 = inlined_call_operand.hbm [shape: f32[48,256], index: 11, kind: output, shape index: {}]  }
   0x1   :  { %17 = vsyncpa [#allocation6], 0 }
   0x2   :  { %18 = vsyncpa [#allocation9], 0 }
   0x3   :  { %19 = vsyncpa [#allocation4], 0 }
   0x4   :  { %21 = vsyncpa [#allocation4 + $0x1], 0  ;;  %s1829_s17 = smov 0   ;;  %s1831_s18 = smov 0  }
   0x5   :  { %s1833_s19 = smov 0   ;;  %s1835_s20 = smov 0  }
   0x6 LB: > { %2038 = sst [smem:[#allocation15_spill]] %s1750_s19  ;;  %s1850_s21 = sadd.s32 4294967295, %s1754_s20   ;;  %s1754_s20 = sphi %s1835_s20, %s2056_s20   ;;  %s1750_s19 = sphi %s1833_s19, %s2053_s19   ;;  %s1746_s18 = sphi %s1831_s18, %s2055_s18   ;;  %s1742_s17 = sphi %s1829_s17, %s2054_s17  }
   0x7   : > { %s1278_s22 = sadd.s32 4294967294, %s1754_s20   ;;  %s1854_s23 = sadd.s32 1, %s1754_s20  }
   0x8   : > { %s270_s24 = sadd.s32 1, %s1750_s19  ;;  %s267_s25 = ssub.s32 %s1754_s20, %s1854_s23 }
   0x9   : > { %p280_p0 = scmp.ne.s32.totalorder %s1750_s19, %s1746_s18  ;;  %p268_p1 = scmp.eq.s32.totalorder %s267_s25, 0 }
   0xa   : > { %p281_p2 = scmp.eq.s32.totalorder %s1850_s21, 2  ;;  %p286_p3 = scmp.ne.s32.totalorder %s1746_s18, %s1742_s17 }
   0xb   : > { %p287_p4 = scmp.eq.s32.totalorder %s1278_s22, 2  ;;  %p1279_p7 = scmp.ge.s32.totalorder %s1754_s20, 1 }
   0xc   : > { %s1865_s26 = scalar_select %p268_p1, %s1750_s19, %s270_s24  }
   0xd   : > { %p1867_p5 = por %p281_p2, %p280_p0  ;;  %p1871_p6 = por %p287_p4, %p286_p3 }
   0xe   : > { %2039 = sst [smem:[#allocation16_spill]] %s1865_s26  ;;  %p294_p8 = scmp.lt.s32.totalorder %s1754_s20, 4 }
   0xf   : > { %s2040_s27 = scalar_select %p1867_p5, 1, 0 }
  0x10   : > { %s2041_s28 = scalar_select %p1871_p6, 1, 0 }
  0x11   : > { %p2035_p9 = scmp.eq.s32.totalorder %s1850_s21, 0  ;;  %p1878_p10 = pnand %p1279_p7, %p294_p8 }
  0x12   : > { %s1756_s30 = smov [#allocation5]   ;;  %s1757_s14 = smov [#allocation2]  }
  0x13   : > { %p1491_p11 = pneg %p1878_p10  ;;  %s328_s12 = sshll.u32 %s1756_s30, 4  ;;  %s329_s12 = int_to_ptr.vmem [resolvable:$true] %s328_s12 }
  0x14   : > { %s312_s15 = sshll.u32 %s1757_s14, 4  ;;  %s1758_s16 = smov [#allocation7]   ;;  %s313_s15 = int_to_ptr.vmem [resolvable:$true] %s312_s15 }
  0x15   : > { %p1886_p12 = pnand %p2035_p9, %p1491_p11  ;;  %s344_s22 = sshll.u32 %s1758_s16, 4  ;;  %s345_s22 = int_to_ptr.vmem [resolvable:$true] %s344_s22 }
  0x16   : > { %s1589_s24 = scalar_lea.vmem %s329_s12, 2048  ;;  %p1597_p3 = scmp.lt.s32.totalorder %s329_s12, %s329_s12 }
  0x17   : > { %p1580_p13 = pneg %p1886_p12  ;;  %p1590_p0 = scmp.ne.s32.totalorder %s329_s12, %s1589_s24 }
  0x18   : > { %p1598_p4 = scmp.lt.s32.totalorder %s1589_s24, %s1589_s24 }
  0x19   : > { %p1592_p1 = pnand %p1590_p0, %p1580_p13 }
  0x1a   : > { %p1599_p7 = por %p1598_p4, %p1597_p3 }
  0x1b   : > { %p1593_p2 = pneg %p1592_p1 }
  0x1d   : > { %p1600_p8 = pnand %p1599_p7, %p1593_p2 }
  0x1f   : > { %1603 = shalt.err (!%p1600_p8)
}
  0x20   : > { %s1759_s25 = smov 128   ;;  %s1760_s30 = smov 8  }
  0x21   : > { %1497 = dma.hbm_to_vmem [thread:$0]  (!%p1886_p12), %s2028_s5, 2048, %s329_s12, [#allocation6], %s1759_s25, %s1759_s25, %s1760_s30  }
  0x22   : > { %s1615_s26 = scalar_lea.vmem %s313_s15, 2048  ;;  %p1623_p9 = scmp.lt.s32.totalorder %s313_s15, %s313_s15 }
  0x23   : > { %p1616_p11 = scmp.ne.s32.totalorder %s313_s15, %s1615_s26  ;;  %p1624_p6 = scmp.lt.s32.totalorder %s1615_s26, %s1615_s26 }
  0x25   : > { %p1618_p0 = pnand %p1616_p11, %p1580_p13  ;;  %p1625_p3 = por %p1624_p6, %p1623_p9 }
  0x27   : > { %p1619_p1 = pneg %p1618_p0 }
  0x29   : > { %p1626_p2 = pnand %p1625_p3, %p1619_p1 }
  0x2b   : > { %1629 = shalt.err (!%p1626_p2)
}
  0x2c   : > { %1494 = dma.hbm_to_vmem [thread:$0]  (!%p1886_p12), %s2026_s3, 2048, %s313_s15, [#allocation3], %s1759_s25, %s1759_s25, %s1760_s30  }
  0x2d   : > { %s1641_s12 = scalar_lea.vmem %s345_s22, 2048  ;;  %p1649_p11 = scmp.lt.s32.totalorder %s345_s22, %s345_s22 }
  0x2e   : > { %p1642_p4 = scmp.ne.s32.totalorder %s345_s22, %s1641_s12  ;;  %p1650_p0 = scmp.lt.s32.totalorder %s1641_s12, %s1641_s12 }
  0x30   : > { %p1644_p7 = pnand %p1642_p4, %p1580_p13  ;;  %p1651_p5 = por %p1650_p0, %p1649_p11 }
  0x32   : > { %p1645_p8 = pneg %p1644_p7 }
  0x34   : > { %p1652_p6 = pnand %p1651_p5, %p1645_p8 }
  0x36   : > { %1655 = shalt.err (!%p1652_p6)
}
  0x37   : > { %1500 = dma.hbm_to_vmem [thread:$0]  (!%p1886_p12), %s2030_s7, 2048, %s345_s22, [#allocation6], %s1759_s25, %s1759_s25, %s1760_s30  }
  0x38   : > { %s1761_s19 = smov [#allocation8]  }
  0x39   : > { %s360_s15 = sshll.u32 %s1761_s19, 4  ;;  %s361_s15 = int_to_ptr.vmem [resolvable:$true] %s360_s15 }
  0x3a   : > { %s1667_s16 = scalar_lea.vmem %s361_s15, 4096  ;;  %p1675_p2 = scmp.lt.s32.totalorder %s361_s15, %s361_s15 }
  0x3b   : > { %p1668_p9 = scmp.ne.s32.totalorder %s361_s15, %s1667_s16  ;;  %p1676_p4 = scmp.lt.s32.totalorder %s1667_s16, %s1667_s16 }
  0x3d   : > { %p1670_p1 = pnand %p1668_p9, %p1580_p13  ;;  %p1677_p5 = por %p1676_p4, %p1675_p2 }
  0x3f   : > { %p1671_p3 = pneg %p1670_p1 }
  0x41   : > { %p1678_p7 = pnand %p1677_p5, %p1671_p3 }
  0x43   : > { %1681 = shalt.err (!%p1678_p7)
}
  0x44   : > { %s1762_s24 = smov 256   ;;  %s1763_s12 = smov 16  }
  0x45   : > { %1503 = dma.hbm_to_vmem [thread:$0]  (!%p1886_p12), %s2032_s9, 4096, %s361_s15, [#allocation9], %s1762_s24, %s1762_s24, %s1763_s12  }
  0x46   : > { %388 = sbr.rel (%p1878_p10) target bundleno = 1224 (0x4c8), region = 64  ;;  %p2044_p8 = scmp.eq.s32.totalorder (!%p1878_p10), %s1850_s21, 0 }
  0x4b   : > { %1725 = dma.done.wait (%p2044_p8), [#allocation3], 2048   ;;  %p2045_p13 = pmov %p2044_p8 }
  0x4c   : > { %p2046_p11 = pmov %p2044_p8 }
  0x4d   : > { %1727 = vsyncadd (%p2045_p13), [#allocation3], 4294965248 }
  0x4e   : > { %1729 = dma.done.wait (%p2046_p11), [#allocation6], 4096   ;;  %p2047_p0 = pmov %p2044_p8 }
  0x50   : > { %1731 = vsyncadd (%p2047_p0), [#allocation6], 4294963200  ;;  %p2048_p6 = pmov %p2047_p0 }
  0x51   : > { %p2049_p12 = pmov %p2047_p0 }
  0x52   : > { %1733 = dma.done.wait (%p2048_p6), [#allocation9], 4096  }
  0x53   : > { %1735 = vsyncadd (%p2049_p12), [#allocation9], 4294963200  ;;  %s1291_s29 = sshll.u32 %s1850_s21, 1  ;;  %v1764_v0 = vmov 0   ;;  %v558_v3 = vld [vmem:[#allocation2 + $0x78] sm:$0xff]  ;;  %v557_v4 = vld [vmem:[#allocation2 + $0x70] sm:$0xff] }
  0x54   : > { %1561 = vset.pattern.permute.xlu0 %v1764_v0  ;;  %p441_p10 = scmp.lt.s32.totalorder %s1291_s29, 5  ;;  %1368 = vmatprep.subr.mxu0 %v558_v3  ;;  %v556_v5 = vld [vmem:[#allocation2 + $0x68] sm:$0xff]  ;;  %v555_v6 = vld [vmem:[#allocation2 + $0x60] sm:$0xff]  ;;  %v554_v7 = vld [vmem:[#allocation2 + $0x58] sm:$0xff]  ;;  %s437_s30 = sand.u32 1, %s1746_s18  }
  0x55   : > { %1369 = vmatpush3.msra.mxu0 %v558_v3  ;;  %v553_v8 = vld [vmem:[#allocation2 + $0x50] sm:$0xff]  ;;  %v552_v9 = vld [vmem:[#allocation2 + $0x48] sm:$0xff]  ;;  %v551_v10 = vld [vmem:[#allocation2 + $0x40] sm:$0xff]  ;;  %s1290_s15 = sshll.u32 %s437_s30, 5  ;;  %s1313_s12 = sshll.u32 %s1850_s21, 9 }
  0x56   : > { %s2058_s29 = smov (!%p441_p10, %s1291_s29), 5  ;;  %1370 = vmatprep.subr.mxu0 %v557_v4  ;;  %v550_v11 = vld [vmem:[#allocation2 + $0x38] sm:$0xff]  ;;  %v549_v12 = vld [vmem:[#allocation2 + $0x30] sm:$0xff]  ;;  %v548_v13 = vld [vmem:[#allocation2 + $0x28] sm:$0xff]  ;;  %s439_s16 = scalar_lea.vmem [#allocation10], %s1290_s15 }
  0x57   : > { %s1292_s13 = sshll.u32 %s2058_s29, 3  ;;  %1371 = vmatpush3.msra.mxu0 %v557_v4  ;;  %v547_v14 = vld [vmem:[#allocation2 + $0x20] sm:$0xff]  ;;  %v546_v15 = vld [vmem:[#allocation2 + $0x18] sm:$0xff]  ;;  %v545_v16 = vld [vmem:[#allocation2 + $0x10] sm:$0xff]  ;;  %s1175_s24 = sshll.u32 %s439_s16, 4  ;;  %s1976_s24 = int_to_ptr.vmem [resolvable:$true] %s1175_s24 }
  0x58   : > { %s444_s14 = scalar_lea.vmem %s2023_s0, %s1292_s13  ;;  %1372 = vmatprep.subr.mxu0 %v556_v5  ;;  %v544_v17 = vld [vmem:[#allocation2 + $0x8] sm:$0xff]  ;;  %v543_v18 = vld [vmem:[#allocation2] sm:$0xff]  ;;  %s1981_s29 = scalar_lea.hbm %s2034_s11, %s1313_s12 }
  0x59   : > { %v447_v1 = vld [vmem:[%s444_s14] sm:$0xff]  ;;  %v448_v2 = vld [vmem:[%s444_s14 + $0x8] sm:$0xff]  ;;  %1373 = vmatpush3.msra.mxu0 %v556_v5  ;;  %s1983_s13 = scalar_lea.sflag [#allocation4], %s437_s30  ;;  %s1682_s25 = scalar_lea.vmem %s1976_s24, 512 }
  0x5a   : > { %452 = vperm.xlu0 %1561, %v447_v1   ;;  %1374 = vmatprep.subr.mxu0 %v555_v6  ;;  %v1293_v19 = vld [vmem:[%s2024_s1] ss:$0 sm:$0xff]  ;;  %p1683_p9 = scmp.ne.s32.totalorder %s1976_s24, %s1682_s25  ;;  %p2050_p1 = scmp.ne.s32.totalorder %s2040_s27, 0 }
  0x5b   : > { %1375 = vmatpush3.msra.mxu0 %v555_v6  ;;  %v1294_v20 = vld [vmem:[%s2025_s2] ss:$0 sm:$0xff]  ;;  %s1766_s21 = smov [#allocation10]  }
  0x5c   : > { %1376 = vmatprep.subr.mxu0 %v554_v7  ;;  %p1684_p3 = pnand %p1683_p9, %p2050_p1  ;;  %s1686_s14 = sshll.u32 %s1766_s21, 4  ;;  %s1687_s14 = int_to_ptr.vmem [resolvable:$false] %s1686_s14 }
  0x5d   : > { %1377 = vmatpush3.msra.mxu0 %v554_v7  ;;  %s1688_s19 = scalar_lea.vmem %s1687_s14, 1024  ;;  %p1689_p4 = scmp.lt.s32.totalorder %s1976_s24, %s1687_s14 }
  0x5e   : > { %457 = vperm.xlu0 %1561, %v448_v2   ;;  %1378 = vmatprep.subr.mxu0 %v553_v8  ;;  %p1685_p2 = pneg %p1684_p3  ;;  %p1690_p5 = scmp.lt.s32.totalorder %s1688_s19, %s1682_s25 }
  0x5f   : > { %1379 = vmatpush3.msra.mxu0 %v553_v8 }
  0x60   : > { %1380 = vmatprep.subr.mxu0 %v552_v9  ;;  %p1691_p7 = por %p1690_p5, %p1689_p4 }
  0x61   : > { %1381 = vmatpush3.msra.mxu0 %v552_v9 }
  0x62   : > { %1382 = vmatprep.subr.mxu0 %v551_v10  ;;  %p1692_p8 = pnand %p1691_p7, %p1685_p2 }
  0x63   : > { %1383 = vmatpush3.msra.mxu0 %v551_v10 }
  0x64   : > { %1384 = vmatprep.subr.mxu0 %v550_v11 }
  0x65   : > { %1385 = vmatpush3.msra.mxu0 %v550_v11 }
  0x66   : > { %1386 = vmatprep.subr.mxu0 %v549_v12 }
  0x67   : > { %1387 = vmatpush3.msra.mxu0 %v549_v12 }
  0x68   : > { %1388 = vmatprep.subr.mxu0 %v548_v13 }
  0x69   : > { %1389 = vmatpush3.msra.mxu0 %v548_v13 }
  0x6a   : > { %1390 = vmatprep.subr.mxu0 %v547_v14 }
  0x6b   : > { %1391 = vmatpush3.msra.mxu0 %v547_v14 }
  0x6c   : > { %1392 = vmatprep.subr.mxu0 %v546_v15 }
  0x6d   : > { %1393 = vmatpush3.msra.mxu0 %v546_v15 }
  0x6e   : > { %1394 = vmatprep.subr.mxu0 %v545_v16 }
  0x6f   : > { %1395 = vmatpush3.msra.mxu0 %v545_v16 }
  0x70   : > { %1396 = vmatprep.subr.mxu0 %v544_v17 }
  0x71   : > { %1397 = vmatpush3.msra.mxu0 %v544_v17 }
  0x72   : > { %1398 = vmatprep.subr.mxu0 %v543_v18 }
  0x73   : > { %1399 = vmatpush3.msra.mxu0 %v543_v18 }
  0xd5   : > { %v453_v21 = vpop.permute.xlu0 %452 }
  0xd6   : > { %v466_v22 = vmul.f32 %v1293_v19, %v453_v21 }
  0xd8   : > { %v475_v23 = vadd.f32 %v1294_v20, %v466_v22 }
  0xd9   : > { %v458_v24 = vpop.permute.xlu0 %457 }
  0xda   : > { %v479_v25 = vmul.f32 0.70710677, %v475_v23  ;;  %v467_v26 = vmul.f32 %v1293_v19, %v458_v24  ;;  %v477_v18 = vmul.f32 0.5, %v475_v23  ;;  %v719_v23 = vld [vmem:[#allocation5 + $0x60] sm:$0xff] }
  0xdc   : > { %v1295_v27 = vclamps-f32 %v479_v25, 4.0  ;;  %v476_v28 = vadd.f32 %v1294_v20, %v467_v26 }
  0xde   : > { %v485_v29 = vmul.f32 %v1295_v27, %v1295_v27  ;;  %v480_v30 = vmul.f32 0.70710677, %v476_v28  ;;  %v478_v25 = vmul.f32 0.5, %v476_v28  ;;  %v716_v28 = vld [vmem:[#allocation5 + $0x48] sm:$0xff] }
  0xe0   : > { %v1296_v31 = vclamps-f32 %v480_v30, 4.0  ;;  %v487_v32 = vmul.f32 -2.7261424e-10, %v485_v29  ;;  %v513_v33 = vmul.f32 -1.45660715e-05, %v485_v29  ;;  %v722_v30 = vld [vmem:[#allocation5 + $0x78] sm:$0xff] }
  0xe1   : > { %1403 = vmatprep.subr.mxu1 %v722_v30 }
  0xe2   : > { %v486_v34 = vmul.f32 %v1296_v31, %v1296_v31  ;;  %v489_v35 = vadd.f32 2.7706815e-08, %v487_v32  ;;  %v515_v36 = vadd.f32 -0.00021337405, %v513_v33  ;;  %1404 = vmatpush3.msra.mxu1 %v722_v30  ;;  %v720_v32 = vld [vmem:[#allocation5 + $0x68] sm:$0xff]  ;;  %v717_v33 = vld [vmem:[#allocation5 + $0x50] sm:$0xff] }
  0xe4   : > { %v488_v37 = vmul.f32 -2.7261424e-10, %v486_v34  ;;  %v491_v38 = vmul.f32 %v489_v35, %v485_v29  ;;  %v517_v39 = vmul.f32 %v515_v36, %v485_v29  ;;  %v514_v40 = vmul.f32 -1.45660715e-05, %v486_v34  ;;  %v714_v35 = vld [vmem:[#allocation5 + $0x38] sm:$0xff]  ;;  %v713_v36 = vld [vmem:[#allocation5 + $0x30] sm:$0xff] }
  0xe6   : > { %v490_v41 = vadd.f32 2.7706815e-08, %v488_v37  ;;  %v493_v42 = vadd.f32 -2.101024e-06, %v491_v38  ;;  %v519_v43 = vadd.f32 -0.001682827, %v517_v39 }
  0xe7   : > { %v516_v44 = vadd.f32 -0.00021337405, %v514_v40  ;;  %v712_v37 = vld [vmem:[#allocation5 + $0x28] sm:$0xff]  ;;  %v711_v38 = vld [vmem:[#allocation5 + $0x20] sm:$0xff]  ;;  %v710_v39 = vld [vmem:[#allocation5 + $0x18] sm:$0xff] }
  0xe8   : > { %v492_v45 = vmul.f32 %v490_v41, %v486_v34  ;;  %v495_v46 = vmul.f32 %v493_v42, %v485_v29  ;;  %v521_v47 = vmul.f32 %v519_v43, %v485_v29  ;;  %v709_v40 = vld [vmem:[#allocation5 + $0x10] sm:$0xff]  ;;  %v708_v41 = vld [vmem:[#allocation5 + $0x8] sm:$0xff]  ;;  %v707_v42 = vld [vmem:[#allocation5] sm:$0xff] }
  0xe9   : > { %v518_v48 = vmul.f32 %v516_v44, %v486_v34  ;;  %v1297_v43 = vld [vmem:[%s2027_s4] ss:$0 sm:$0xff] }
  0xea   : > { %v494_v49 = vadd.f32 -2.101024e-06, %v492_v45  ;;  %v497_v50 = vadd.f32 -5.6925062e-05, %v495_v46  ;;  %v523_v51 = vadd.f32 -0.0073733293, %v521_v47 }
  0xeb   : > { %v520_v52 = vadd.f32 -0.001682827, %v518_v48 }
  0xec   : > { %v496_v53 = vmul.f32 %v494_v49, %v486_v34  ;;  %v499_v54 = vmul.f32 %v497_v50, %v485_v29  ;;  %v525_v55 = vmul.f32 %v523_v51, %v485_v29 }
  0xed   : > { %v522_v56 = vmul.f32 %v520_v52, %v486_v34 }
  0xee   : > { %v498_v57 = vadd.f32 -5.6925062e-05, %v496_v53  ;;  %v501_v58 = vadd.f32 -0.00073499064, %v499_v54  ;;  %v527_v59 = vadd.f32 -0.014264739, %v525_v55 }
  0xef   : > { %v524_v60 = vadd.f32 -0.0073733293, %v522_v56 }
  0xf0   : > { %v500_v61 = vmul.f32 %v498_v57, %v486_v34  ;;  %1562 = vrcp.f32 %v527_v59  ;;  %v503_v63 = vmul.f32 %v501_v58, %v485_v29 }
  0xf1   : > { %v526_v62 = vmul.f32 %v524_v60, %v486_v34 }
  0xf2   : > { %v502_v0 = vadd.f32 -0.00073499064, %v500_v61  ;;  %v505_v2 = vadd.f32 -0.0029546, %v503_v63 }
  0xf3   : > { %v528_v1 = vadd.f32 -0.014264739, %v526_v62 }
  0xf4   : > { %v504_v3 = vmul.f32 %v502_v0, %v486_v34  ;;  %v507_v4 = vmul.f32 %v505_v2, %v485_v29 }
  0xf5   : > { %1564 = vrcp.f32 %v528_v1 }
  0xf6   : > { %v506_v5 = vadd.f32 -0.0029546, %v504_v3  ;;  %v509_v7 = vadd.f32 -0.016096033, %v507_v4 }
  0xf8   : > { %v508_v9 = vmul.f32 %v506_v5, %v486_v34  ;;  %v511_v12 = vmul.f32 %v1295_v27, %v509_v7  ;;  %v721_v27 = vld [vmem:[#allocation5 + $0x70] sm:$0xff]  ;;  %v715_v34 = vld [vmem:[#allocation5 + $0x40] sm:$0xff] }
  0xf9   : > { %1405 = vmatprep.subr.mxu1 %v721_v27 }
  0xfa   : > { %v510_v14 = vadd.f32 -0.016096033, %v508_v9  ;;  %1406 = vmatpush3.msra.mxu1 %v721_v27 }
  0xfb   : > { %1407 = vmatprep.subr.mxu1 %v720_v32 }
  0xfc   : > { %v512_v20 = vmul.f32 %v1296_v31, %v510_v14  ;;  %1408 = vmatpush3.msra.mxu1 %v720_v32  ;;  %v718_v31 = vld [vmem:[#allocation5 + $0x58] sm:$0xff] }
  0xfd   : > { %v1563_v6 = vpop.eup %1562  ;;  %1409 = vmatprep.subr.mxu1 %v719_v23 }
  0xfe   : > { %v531_v8 = vmul.f32 %v1563_v6, %v527_v59  ;;  %1410 = vmatpush3.msra.mxu1 %v719_v23 }
  0xff   : > { %1411 = vmatprep.subr.mxu1 %v718_v31 }
 0x100   : > { %v533_v10 = vsub.f32 2.0, %v531_v8  ;;  %1412 = vmatpush3.msra.mxu1 %v718_v31 }
 0x101   : > { %1413 = vmatprep.subr.mxu1 %v717_v33 }
 0x102   : > { %v1565_v11 = vpop.eup %1564  ;;  %v535_v13 = vmul.f32 %v1563_v6, %v533_v10  ;;  %1414 = vmatpush3.msra.mxu1 %v717_v33 }
 0x103   : > { %v532_v15 = vmul.f32 %v1565_v11, %v528_v1  ;;  %1415 = vmatprep.subr.mxu1 %v716_v28 }
 0x104   : > { %v537_v16 = vmul.f32 %v535_v13, %v511_v12  ;;  %1416 = vmatpush3.msra.mxu1 %v716_v28 }
 0x105   : > { %v534_v17 = vsub.f32 2.0, %v532_v15  ;;  %1417 = vmatprep.subr.mxu1 %v715_v34 }
 0x106   : > { %v539_v19 = vadd.f32 1.0, %v537_v16  ;;  %1418 = vmatpush3.msra.mxu1 %v715_v34 }
 0x107   : > { %v536_v21 = vmul.f32 %v1565_v11, %v534_v17  ;;  %1419 = vmatprep.subr.mxu1 %v714_v35 }
 0x108   : > { %v541_v22 = vmul.f32 %v539_v19, %v477_v18  ;;  %1420 = vmatpush3.msra.mxu1 %v714_v35 }
 0x109   : > { %v538_v24 = vmul.f32 %v536_v21, %v512_v20  ;;  %1421 = vmatprep.subr.mxu1 %v713_v36 }
 0x10a   : > { %1400 = vmatprep.mubr.f32.mxu0 %v541_v22  ;;  %1422 = vmatpush3.msra.mxu1 %v713_v36 }
 0x10b   : > { %v540_v26 = vadd.f32 1.0, %v538_v24  ;;  %1423 = vmatprep.subr.mxu1 %v712_v37 }
 0x10c   : > { %1424 = vmatpush3.msra.mxu1 %v712_v37 }
 0x10d   : > { %v542_v29 = vmul.f32 %v540_v26, %v478_v25  ;;  %1425 = vmatprep.subr.mxu1 %v711_v38 }
 0x10e   : > { %1426 = vmatpush3.msra.mxu1 %v711_v38 }
 0x10f   : > { %1401 = vmatmul.mubr.f32.vlgmr.msra.gmra.mxu0 %v542_v29  ;;  %1427 = vmatprep.subr.mxu1 %v710_v39 }
 0x110   : > { %1428 = vmatpush3.msra.mxu1 %v710_v39 }
 0x111   : > { %1429 = vmatprep.subr.mxu1 %v709_v40 }
 0x112   : > { %1430 = vmatpush3.msra.mxu1 %v709_v40 }
 0x113   : > { %1431 = vmatprep.subr.mxu1 %v708_v41 }
 0x114   : > { %1432 = vmatpush3.msra.mxu1 %v708_v41 }
 0x115   : > { %1433 = vmatprep.subr.mxu1 %v707_v42 }
 0x116   : > { %1434 = vmatpush3.msra.mxu1 %v707_v42 }
 0x1cf   : > { %v1402_v44 = vpop.f32.mrf.mxu0 }
 0x1d0   : > { %v1951_v45 = vadd.f32 %v1402_v44, %v1297_v43 }
 0x1d1   : > { %v632_v46 = vpop.f32.mrf.mxu0 }
 0x1d2   : > { %v644_v47 = vmul.f32 0.70710677, %v1951_v45  ;;  %v633_v48 = vadd.f32 %v1297_v43, %v632_v46  ;;  %v642_v46 = vmul.f32 0.5, %v1951_v45  ;;  %v881_v45 = vld [vmem:[#allocation7 + $0x50] sm:$0xff] }
 0x1d4   : > { %v1299_v49 = vclamps-f32 %v644_v47, 4.0  ;;  %v643_v50 = vmul.f32 0.70710677, %v633_v48  ;;  %v641_v43 = vmul.f32 0.5, %v633_v48  ;;  %v882_v48 = vld [vmem:[#allocation7 + $0x58] sm:$0xff] }
 0x1d6   : > { %v650_v51 = vmul.f32 %v1299_v49, %v1299_v49  ;;  %v1298_v52 = vclamps-f32 %v643_v50, 4.0 }
 0x1d8   : > { %v652_v53 = vmul.f32 -2.7261424e-10, %v650_v51  ;;  %v649_v54 = vmul.f32 %v1298_v52, %v1298_v52  ;;  %v678_v55 = vmul.f32 -1.45660715e-05, %v650_v51 }
 0x1da   : > { %v654_v56 = vadd.f32 2.7706815e-08, %v652_v53  ;;  %v651_v57 = vmul.f32 -2.7261424e-10, %v649_v54  ;;  %v677_v58 = vmul.f32 -1.45660715e-05, %v649_v54 }
 0x1db   : > { %v680_v59 = vadd.f32 -0.00021337405, %v678_v55  ;;  %v885_v53 = vld [vmem:[#allocation7 + $0x70] sm:$0xff]  ;;  %v879_v55 = vld [vmem:[#allocation7 + $0x40] sm:$0xff] }
 0x1dc   : > { %v656_v60 = vmul.f32 %v654_v56, %v650_v51  ;;  %v653_v61 = vadd.f32 2.7706815e-08, %v651_v57  ;;  %v679_v62 = vadd.f32 -0.00021337405, %v677_v58  ;;  %v878_v56 = vld [vmem:[#allocation7 + $0x38] sm:$0xff]  ;;  %v877_v57 = vld [vmem:[#allocation7 + $0x30] sm:$0xff] }
 0x1dd   : > { %v682_v63 = vmul.f32 %v680_v59, %v650_v51  ;;  %v876_v58 = vld [vmem:[#allocation7 + $0x28] sm:$0xff]  ;;  %v875_v59 = vld [vmem:[#allocation7 + $0x20] sm:$0xff] }
 0x1de   : > { %v658_v0 = vadd.f32 -2.101024e-06, %v656_v60  ;;  %v655_v1 = vmul.f32 %v653_v61, %v649_v54  ;;  %v681_v2 = vmul.f32 %v679_v62, %v649_v54  ;;  %v874_v60 = vld [vmem:[#allocation7 + $0x18] sm:$0xff]  ;;  %v873_v61 = vld [vmem:[#allocation7 + $0x10] sm:$0xff]  ;;  %v872_v62 = vld [vmem:[#allocation7 + $0x8] sm:$0xff] }
 0x1df   : > { %v684_v3 = vadd.f32 -0.001682827, %v682_v63  ;;  %v871_v63 = vld [vmem:[#allocation7] sm:$0xff] }
 0x1e0   : > { %v660_v4 = vmul.f32 %v658_v0, %v650_v51  ;;  %v657_v5 = vadd.f32 -2.101024e-06, %v655_v1  ;;  %v683_v6 = vadd.f32 -0.001682827, %v681_v2  ;;  %v1300_v0 = vld [vmem:[%s2029_s6] ss:$0 sm:$0xff] }
 0x1e1   : > { %v686_v7 = vmul.f32 %v684_v3, %v650_v51 }
 0x1e2   : > { %v662_v8 = vadd.f32 -5.6925062e-05, %v660_v4  ;;  %v659_v9 = vmul.f32 %v657_v5, %v649_v54  ;;  %v685_v10 = vmul.f32 %v683_v6, %v649_v54 }
 0x1e3   : > { %v688_v11 = vadd.f32 -0.0073733293, %v686_v7 }
 0x1e4   : > { %v664_v12 = vmul.f32 %v662_v8, %v650_v51  ;;  %v661_v13 = vadd.f32 -5.6925062e-05, %v659_v9  ;;  %v687_v14 = vadd.f32 -0.0073733293, %v685_v10 }
 0x1e5   : > { %v690_v15 = vmul.f32 %v688_v11, %v650_v51 }
 0x1e6   : > { %v663_v16 = vmul.f32 %v661_v13, %v649_v54  ;;  %v689_v17 = vmul.f32 %v687_v14, %v649_v54  ;;  %v666_v18 = vadd.f32 -0.00073499064, %v664_v12 }
 0x1e7   : > { %v692_v19 = vadd.f32 -0.014264739, %v690_v15 }
 0x1e8   : > { %v665_v20 = vadd.f32 -0.00073499064, %v663_v16  ;;  %v691_v21 = vadd.f32 -0.014264739, %v689_v17  ;;  %v668_v22 = vmul.f32 %v666_v18, %v650_v51 }
 0x1e9   : > { %1566 = vrcp.f32 %v692_v19 }
 0x1ea   : > { %1568 = vrcp.f32 %v691_v21  ;;  %v667_v24 = vmul.f32 %v665_v20, %v649_v54  ;;  %v670_v25 = vadd.f32 -0.0029546, %v668_v22 }
 0x1ec   : > { %v669_v26 = vadd.f32 -0.0029546, %v667_v24  ;;  %v672_v29 = vmul.f32 %v670_v25, %v650_v51  ;;  %v886_v51 = vld [vmem:[#allocation7 + $0x78] sm:$0xff] }
 0x1ed   : > { %1438 = vmatprep.subr.mxu0 %v886_v51 }
 0x1ee   : > { %v671_v30 = vmul.f32 %v669_v26, %v649_v54  ;;  %v674_v23 = vadd.f32 -0.016096033, %v672_v29  ;;  %1439 = vmatpush3.msra.mxu0 %v886_v51  ;;  %v880_v54 = vld [vmem:[#allocation7 + $0x48] sm:$0xff] }
 0x1ef   : > { %1440 = vmatprep.subr.mxu0 %v885_v53 }
 0x1f0   : > { %v673_v33 = vadd.f32 -0.016096033, %v671_v30  ;;  %v676_v36 = vmul.f32 %v1299_v49, %v674_v23  ;;  %1441 = vmatpush3.msra.mxu0 %v885_v53  ;;  %v884_v49 = vld [vmem:[#allocation7 + $0x68] sm:$0xff] }
 0x1f1   : > { %1442 = vmatprep.subr.mxu0 %v884_v49 }
 0x1f2   : > { %v675_v38 = vmul.f32 %v1298_v52, %v673_v33  ;;  %1443 = vmatpush3.msra.mxu0 %v884_v49  ;;  %v883_v52 = vld [vmem:[#allocation7 + $0x60] sm:$0xff] }
 0x1f3   : > { %1444 = vmatprep.subr.mxu0 %v883_v52 }
 0x1f4   : > { %1445 = vmatpush3.msra.mxu0 %v883_v52 }
 0x1f5   : > { %1446 = vmatprep.subr.mxu0 %v882_v48 }
 0x1f6   : > { %v1567_v27 = vpop.eup %1566  ;;  %1447 = vmatpush3.msra.mxu0 %v882_v48 }
 0x1f7   : > { %v1569_v32 = vpop.eup %1568  ;;  %v696_v31 = vmul.f32 %v1567_v27, %v692_v19  ;;  %1448 = vmatprep.subr.mxu0 %v881_v45 }
 0x1f8   : > { %v695_v28 = vmul.f32 %v1569_v32, %v691_v21  ;;  %1449 = vmatpush3.msra.mxu0 %v881_v45 }
 0x1f9   : > { %v698_v34 = vsub.f32 2.0, %v696_v31  ;;  %1450 = vmatprep.subr.mxu0 %v880_v54 }
 0x1fa   : > { %v697_v35 = vsub.f32 2.0, %v695_v28  ;;  %1451 = vmatpush3.msra.mxu0 %v880_v54 }
 0x1fb   : > { %v700_v37 = vmul.f32 %v1567_v27, %v698_v34  ;;  %1452 = vmatprep.subr.mxu0 %v879_v55 }
 0x1fc   : > { %v699_v39 = vmul.f32 %v1569_v32, %v697_v35  ;;  %1453 = vmatpush3.msra.mxu0 %v879_v55 }
 0x1fd   : > { %v702_v40 = vmul.f32 %v700_v37, %v676_v36  ;;  %1454 = vmatprep.subr.mxu0 %v878_v56 }
 0x1fe   : > { %v701_v41 = vmul.f32 %v699_v39, %v675_v38  ;;  %1455 = vmatpush3.msra.mxu0 %v878_v56 }
 0x1ff   : > { %v704_v42 = vadd.f32 1.0, %v702_v40  ;;  %1456 = vmatprep.subr.mxu0 %v877_v57 }
 0x200   : > { %v703_v44 = vadd.f32 1.0, %v701_v41  ;;  %1457 = vmatpush3.msra.mxu0 %v877_v57 }
 0x201   : > { %v706_v50 = vmul.f32 %v704_v42, %v642_v46  ;;  %1458 = vmatprep.subr.mxu0 %v876_v58 }
 0x202   : > { %v705_v47 = vmul.f32 %v703_v44, %v641_v43  ;;  %1459 = vmatpush3.msra.mxu0 %v876_v58 }
 0x203   : > { %1460 = vmatprep.subr.mxu0 %v875_v59 }
 0x204   : > { %1435 = vmatprep.mubr.f32.mxu1 %v705_v47  ;;  %1461 = vmatpush3.msra.mxu0 %v875_v59 }
 0x205   : > { %1436 = vmatmul.mubr.f32.vlgmr.msra.gmra.mxu1 %v706_v50  ;;  %1462 = vmatprep.subr.mxu0 %v874_v60 }
 0x206   : > { %1463 = vmatpush3.msra.mxu0 %v874_v60 }
 0x207   : > { %1464 = vmatprep.subr.mxu0 %v873_v61 }
 0x208   : > { %1465 = vmatpush3.msra.mxu0 %v873_v61 }
 0x209   : > { %1466 = vmatprep.subr.mxu0 %v872_v62 }
 0x20a   : > { %1467 = vmatpush3.msra.mxu0 %v872_v62 }
 0x20b   : > { %1468 = vmatprep.subr.mxu0 %v871_v63 }
 0x20c   : > { %1469 = vmatpush3.msra.mxu0 %v871_v63 }
 0x2c5   : > { %v1437_v1 = vpop.f32.mrf.mxu1 }
 0x2c6   : > { %v1958_v2 = vadd.f32 %v1437_v1, %v1300_v0 }
 0x2c7   : > { %v796_v3 = vpop.f32.mrf.mxu1 }
 0x2c8   : > { %v808_v4 = vmul.f32 0.70710677, %v1958_v2  ;;  %v797_v5 = vadd.f32 %v1300_v0, %v796_v3  ;;  %v806_v3 = vmul.f32 0.5, %v1958_v2  ;;  %v1058_v2 = vld [vmem:[#allocation8 + $0xb8] sm:$0xff] }
 0x2ca   : > { %v1302_v6 = vclamps-f32 %v808_v4, 4.0  ;;  %v807_v7 = vmul.f32 0.70710677, %v797_v5  ;;  %v805_v0 = vmul.f32 0.5, %v797_v5  ;;  %v1060_v5 = vld [vmem:[#allocation8 + $0xc8] sm:$0xff] }
 0x2cc   : > { %v814_v8 = vmul.f32 %v1302_v6, %v1302_v6  ;;  %v1301_v9 = vclamps-f32 %v807_v7, 4.0 }
 0x2ce   : > { %v816_v10 = vmul.f32 -2.7261424e-10, %v814_v8  ;;  %v842_v11 = vmul.f32 -1.45660715e-05, %v814_v8  ;;  %v813_v12 = vmul.f32 %v1301_v9, %v1301_v9 }
 0x2d0   : > { %v818_v13 = vadd.f32 2.7706815e-08, %v816_v10  ;;  %v844_v14 = vadd.f32 -0.00021337405, %v842_v11  ;;  %v815_v15 = vmul.f32 -2.7261424e-10, %v813_v12 }
 0x2d1   : > { %v841_v16 = vmul.f32 -1.45660715e-05, %v813_v12  ;;  %v1065_v10 = vld [vmem:[#allocation8 + $0xf0] sm:$0xff]  ;;  %v1063_v11 = vld [vmem:[#allocation8 + $0xe0] sm:$0xff] }
 0x2d2   : > { %v820_v17 = vmul.f32 %v818_v13, %v814_v8  ;;  %v846_v18 = vmul.f32 %v844_v14, %v814_v8  ;;  %v817_v19 = vadd.f32 2.7706815e-08, %v815_v15  ;;  %v1059_v13 = vld [vmem:[#allocation8 + $0xc0] sm:$0xff]  ;;  %v1057_v14 = vld [vmem:[#allocation8 + $0xb0] sm:$0xff]  ;;  %v1056_v15 = vld [vmem:[#allocation8 + $0xa8] sm:$0xff] }
 0x2d3   : > { %v843_v20 = vadd.f32 -0.00021337405, %v841_v16  ;;  %v1055_v16 = vld [vmem:[#allocation8 + $0xa0] sm:$0xff] }
 0x2d4   : > { %v822_v21 = vadd.f32 -2.101024e-06, %v820_v17  ;;  %v848_v22 = vadd.f32 -0.001682827, %v846_v18  ;;  %v819_v24 = vmul.f32 %v817_v19, %v813_v12  ;;  %v1054_v17 = vld [vmem:[#allocation8 + $0x98] sm:$0xff]  ;;  %v1053_v18 = vld [vmem:[#allocation8 + $0x90] sm:$0xff] }
 0x2d5   : > { %v845_v25 = vmul.f32 %v843_v20, %v813_v12  ;;  %v1052_v19 = vld [vmem:[#allocation8 + $0x88] sm:$0xff]  ;;  %v1051_v20 = vld [vmem:[#allocation8 + $0x80] sm:$0xff] }
 0x2d6   : > { %v824_v26 = vmul.f32 %v822_v21, %v814_v8  ;;  %v850_v29 = vmul.f32 %v848_v22, %v814_v8  ;;  %v821_v30 = vadd.f32 -2.101024e-06, %v819_v24  ;;  %v1050_v21 = vld [vmem:[#allocation8 + $0x78] sm:$0xff]  ;;  %v1049_v22 = vld [vmem:[#allocation8 + $0x70] sm:$0xff]  ;;  %v1048_v24 = vld [vmem:[#allocation8 + $0x68] sm:$0xff] }
 0x2d7   : > { %v847_v27 = vadd.f32 -0.001682827, %v845_v25  ;;  %v1047_v25 = vld [vmem:[#allocation8 + $0x60] sm:$0xff] }
 0x2d8   : > { %v826_v32 = vadd.f32 -5.6925062e-05, %v824_v26  ;;  %v852_v23 = vadd.f32 -0.0073733293, %v850_v29  ;;  %v823_v31 = vmul.f32 %v821_v30, %v813_v12  ;;  %v1046_v26 = vld [vmem:[#allocation8 + $0x58] sm:$0xff]  ;;  %v1045_v29 = vld [vmem:[#allocation8 + $0x50] sm:$0xff] }
 0x2d9   : > { %v849_v33 = vmul.f32 %v847_v27, %v813_v12  ;;  %v1044_v30 = vld [vmem:[#allocation8 + $0x48] sm:$0xff]  ;;  %v1043_v27 = vld [vmem:[#allocation8 + $0x40] sm:$0xff] }
 0x2da   : > { %v828_v28 = vmul.f32 %v826_v32, %v814_v8  ;;  %v854_v34 = vmul.f32 %v852_v23, %v814_v8  ;;  %v825_v35 = vadd.f32 -5.6925062e-05, %v823_v31  ;;  %v1042_v32 = vld [vmem:[#allocation8 + $0x38] sm:$0xff]  ;;  %v1041_v23 = vld [vmem:[#allocation8 + $0x30] sm:$0xff]  ;;  %v1040_v31 = vld [vmem:[#allocation8 + $0x28] sm:$0xff] }
 0x2db   : > { %v851_v36 = vadd.f32 -0.0073733293, %v849_v33  ;;  %v1039_v33 = vld [vmem:[#allocation8 + $0x20] sm:$0xff] }
 0x2dc   : > { %v830_v37 = vadd.f32 -0.00073499064, %v828_v28  ;;  %v856_v38 = vadd.f32 -0.014264739, %v854_v34  ;;  %v827_v39 = vmul.f32 %v825_v35, %v813_v12  ;;  %v1038_v28 = vld [vmem:[#allocation8 + $0x18] sm:$0xff]  ;;  %v1037_v34 = vld [vmem:[#allocation8 + $0x10] sm:$0xff] }
 0x2dd   : > { %v853_v40 = vmul.f32 %v851_v36, %v813_v12  ;;  %v1036_v35 = vld [vmem:[#allocation8 + $0x8] sm:$0xff]  ;;  %v1035_v36 = vld [vmem:[#allocation8] sm:$0xff] }
 0x2de   : > { %1570 = vrcp.f32 %v856_v38  ;;  %v829_v41 = vadd.f32 -0.00073499064, %v827_v39  ;;  %v832_v43 = vmul.f32 %v830_v37, %v814_v8  ;;  %v1765_v37 = vmov 0.0  }
 0x2df   : > { %v855_v42 = vadd.f32 -0.014264739, %v853_v40  ;;  %1143 = vmatprep.mubr.f32.mxu1 %v1765_v37 }
 0x2e0   : > { %v831_v44 = vmul.f32 %v829_v41, %v813_v12  ;;  %v834_v46 = vadd.f32 -0.0029546, %v832_v43 }
 0x2e1   : > { %1572 = vrcp.f32 %v855_v42 }
 0x2e2   : > { %v833_v47 = vadd.f32 -0.0029546, %v831_v44  ;;  %v836_v50 = vmul.f32 %v834_v46, %v814_v8  ;;  %v1066_v8 = vld [vmem:[#allocation8 + $0xf8] sm:$0xff] }
 0x2e3   : > { %1079 = vmatprep.subr.mxu1 %v1066_v8 }
 0x2e4   : > { %v835_v53 = vmul.f32 %v833_v47, %v813_v12  ;;  %v838_v49 = vadd.f32 -0.016096033, %v836_v50  ;;  %1080 = vmatpush1.msra.mxu1 %v1065_v10  ;;  %v1061_v12 = vld [vmem:[#allocation8 + $0xd0] sm:$0xff] }
 0x2e6   : > { %v837_v54 = vadd.f32 -0.016096033, %v835_v53  ;;  %v840_v56 = vmul.f32 %v1302_v6, %v838_v49  ;;  %v1064_v6 = vld [vmem:[#allocation8 + $0xe8] sm:$0xff] }
 0x2e7   : > { %1081 = vmatprep.subr.mxu1 %v1064_v6 }
 0x2e8   : > { %v839_v60 = vmul.f32 %v1301_v9, %v837_v54  ;;  %1082 = vmatpush1.msra.mxu1 %v1063_v11  ;;  %v1062_v9 = vld [vmem:[#allocation8 + $0xd8] sm:$0xff] }
 0x2e9   : > { %1083 = vmatprep.subr.mxu1 %v1062_v9 }
 0x2ea   : > { %1084 = vmatpush1.msra.mxu1 %v1061_v12 }
 0x2eb   : > { %v1571_v51 = vpop.eup %1570  ;;  %1085 = vmatprep.subr.mxu1 %v1060_v5 }
 0x2ec   : > { %v860_v52 = vmul.f32 %v1571_v51, %v856_v38  ;;  %1086 = vmatpush1.msra.mxu1 %v1059_v13  ;;  %v1303_v38 = vld [vmem:[%s2031_s8] ss:$0 sm:$0xff] }
 0x2ed   : > { %1087 = vmatprep.subr.mxu1 %v1058_v2 }
 0x2ee   : > { %v1573_v48 = vpop.eup %1572  ;;  %v862_v45 = vsub.f32 2.0, %v860_v52  ;;  %1088 = vmatpush1.msra.mxu1 %v1057_v14 }
 0x2ef   : > { %v859_v55 = vmul.f32 %v1573_v48, %v855_v42  ;;  %1089 = vmatprep.subr.mxu1 %v1056_v15 }
 0x2f0   : > { %v864_v57 = vmul.f32 %v1571_v51, %v862_v45  ;;  %1090 = vmatpush1.msra.mxu1 %v1055_v16 }
 0x2f1   : > { %v861_v58 = vsub.f32 2.0, %v859_v55  ;;  %1091 = vmatprep.subr.mxu1 %v1054_v17 }
 0x2f2   : > { %v866_v59 = vmul.f32 %v864_v57, %v840_v56  ;;  %1092 = vmatpush1.msra.mxu1 %v1053_v18 }
 0x2f3   : > { %v863_v61 = vmul.f32 %v1573_v48, %v861_v58  ;;  %1093 = vmatprep.subr.mxu1 %v1052_v19 }
 0x2f4   : > { %v868_v63 = vadd.f32 1.0, %v866_v59  ;;  %1094 = vmatpush1.msra.mxu1 %v1051_v20 }
 0x2f5   : > { %v865_v62 = vmul.f32 %v863_v61, %v839_v60  ;;  %1095 = vmatprep.subr.mxu1 %v1050_v21 }
 0x2f6   : > { %v870_v7 = vmul.f32 %v868_v63, %v806_v3  ;;  %1096 = vmatpush1.msra.mxu1 %v1049_v22 }
 0x2f7   : > { %v867_v1 = vadd.f32 1.0, %v865_v62  ;;  %1097 = vmatprep.subr.mxu1 %v1048_v24 }
 0x2f8   : > { %1098 = vmatpush1.msra.mxu1 %v1047_v25 }
 0x2f9   : > { %v869_v4 = vmul.f32 %v867_v1, %v805_v0  ;;  %1099 = vmatprep.subr.mxu1 %v1046_v26 }
 0x2fa   : > { %1100 = vmatpush1.msra.mxu1 %v1045_v29 }
 0x2fb   : > { %1470 = vmatprep.mubr.f32.mxu0 %v869_v4  ;;  %1101 = vmatprep.subr.mxu1 %v1044_v30 }
 0x2fc   : > { %1471 = vmatmul.mubr.f32.vlgmr.msra.gmra.mxu0 %v870_v7  ;;  %1102 = vmatpush1.msra.mxu1 %v1043_v27 }
 0x2fd   : > { %1103 = vmatprep.subr.mxu1 %v1042_v32 }
 0x2fe   : > { %1104 = vmatpush1.msra.mxu1 %v1041_v23 }
 0x2ff   : > { %1105 = vmatprep.subr.mxu1 %v1040_v31 }
 0x300   : > { %1106 = vmatpush1.msra.mxu1 %v1039_v33 }
 0x301   : > { %1107 = vmatprep.subr.mxu1 %v1038_v28 }
 0x302   : > { %1108 = vmatpush1.msra.mxu1 %v1037_v34 }
 0x303   : > { %1109 = vmatprep.subr.mxu1 %v1036_v35 }
 0x304   : > { %1110 = vmatpush1.msra.mxu1 %v1035_v36 }
 0x3bc   : > { %v1472_v39 = vpop.f32.mrf.mxu0 }
 0x3bd   : > { %v1966_v40 = vadd.f32 %v1472_v39, %v1303_v38 }
 0x3be   : > { %v960_v41 = vpop.f32.mrf.mxu0 }
 0x3bf   : > { %v972_v42 = vmul.f32 0.70710677, %v1966_v40  ;;  %v961_v43 = vadd.f32 %v1303_v38, %v960_v41 }
 0x3c1   : > { %v1305_v44 = vclamps-f32 %v972_v42, 4.0  ;;  %v971_v46 = vmul.f32 0.70710677, %v961_v43  ;;  %v969_v38 = vmul.f32 0.5, %v961_v43 }
 0x3c3   : > { %v978_v47 = vmul.f32 %v1305_v44, %v1305_v44  ;;  %v1304_v50 = vclamps-f32 %v971_v46, 4.0  ;;  %v970_v46 = vmul.f32 0.5, %v1966_v40 }
 0x3c5   : > { %v980_v51 = vmul.f32 -2.7261424e-10, %v978_v47  ;;  %v977_v53 = vmul.f32 %v1304_v50, %v1304_v50  ;;  %v1006_v49 = vmul.f32 -1.45660715e-05, %v978_v47 }
 0x3c7   : > { %v982_v52 = vadd.f32 2.7706815e-08, %v980_v51  ;;  %v979_v48 = vmul.f32 -2.7261424e-10, %v977_v53  ;;  %v1005_v45 = vmul.f32 -1.45660715e-05, %v977_v53  ;;  %v1069_v51 = vlaneseq }
 0x3c8   : > { %v1008_v54 = vadd.f32 -0.00021337405, %v1006_v49 }
 0x3c9   : > { %v984_v55 = vmul.f32 %v982_v52, %v978_v47  ;;  %v981_v56 = vadd.f32 2.7706815e-08, %v979_v48  ;;  %v1007_v57 = vadd.f32 -0.00021337405, %v1005_v45 }
 0x3ca   : > { %v1010_v58 = vmul.f32 %v1008_v54, %v978_v47 }
 0x3cb   : > { %v986_v59 = vadd.f32 -2.101024e-06, %v984_v55  ;;  %v983_v60 = vmul.f32 %v981_v56, %v977_v53  ;;  %v1009_v61 = vmul.f32 %v1007_v57, %v977_v53 }
 0x3cc   : > { %v1012_v62 = vadd.f32 -0.001682827, %v1010_v58 }
 0x3cd   : > { %v988_v63 = vmul.f32 %v986_v59, %v978_v47  ;;  %v985_v0 = vadd.f32 -2.101024e-06, %v983_v60  ;;  %v1011_v1 = vadd.f32 -0.001682827, %v1009_v61 }
 0x3ce   : > { %v1014_v3 = vmul.f32 %v1012_v62, %v978_v47 }
 0x3cf   : > { %v990_v4 = vadd.f32 -5.6925062e-05, %v988_v63  ;;  %v987_v7 = vmul.f32 %v985_v0, %v977_v53  ;;  %v1013_v8 = vmul.f32 %v1011_v1, %v977_v53 }
 0x3d0   : > { %v1016_v10 = vadd.f32 -0.0073733293, %v1014_v3 }
 0x3d1   : > { %v992_v6 = vmul.f32 %v990_v4, %v978_v47  ;;  %v989_v11 = vadd.f32 -5.6925062e-05, %v987_v7  ;;  %v1015_v9 = vadd.f32 -0.0073733293, %v1013_v8 }
 0x3d2   : > { %v1018_v12 = vmul.f32 %v1016_v10, %v978_v47 }
 0x3d3   : > { %v991_v5 = vmul.f32 %v989_v11, %v977_v53  ;;  %v1017_v13 = vmul.f32 %v1015_v9, %v977_v53  ;;  %v994_v14 = vadd.f32 -0.00073499064, %v992_v6 }
 0x3d4   : > { %v1020_v2 = vadd.f32 -0.014264739, %v1018_v12 }
 0x3d5   : > { %v993_v15 = vadd.f32 -0.00073499064, %v991_v5  ;;  %v1019_v16 = vadd.f32 -0.014264739, %v1017_v13  ;;  %v996_v17 = vmul.f32 %v994_v14, %v978_v47 }
 0x3d6   : > { %1574 = vrcp.f32 %v1020_v2 }
 0x3d7   : > { %1576 = vrcp.f32 %v1019_v16  ;;  %v995_v18 = vmul.f32 %v993_v15, %v977_v53  ;;  %v998_v19 = vadd.f32 -0.0029546, %v996_v17 }
 0x3d9   : > { %v997_v20 = vadd.f32 -0.0029546, %v995_v18  ;;  %v1000_v21 = vmul.f32 %v998_v19, %v978_v47 }
 0x3db   : > { %v999_v22 = vmul.f32 %v997_v20, %v977_v53  ;;  %v1002_v29 = vadd.f32 -0.016096033, %v1000_v21  ;;  %v1070_v53 = vshrl.u32 %v1069_v51, 7 }
 0x3dd   : > { %v1001_v30 = vadd.f32 -0.016096033, %v999_v22  ;;  %v1004_v33 = vmul.f32 %v1305_v44, %v1002_v29  ;;  %v1071_v44 = vsub.s32 0, %v1070_v53  ;;  %v1075_v43 = vsub.s32 1, %v1070_v53 }
 0x3df   : > { %v1003_v28 = vmul.f32 %v1304_v50, %v1001_v30  ;;  %v1067_v50 = vld [vmem:[%s2033_s10] sm:$0x3] }
 0x3e0   : > { %v1072_v49 = vrot.slane %v1067_v50, %v1071_v44  ;;  %v1076_v52 = vrot.slane %v1067_v50, %v1075_v43 }
 0x3e3   : > { %v1575_v24 = vpop.eup %1574 }
 0x3e4   : > { %v1577_v25 = vpop.eup %1576  ;;  %v1024_v26 = vmul.f32 %v1575_v24, %v1020_v2 }
 0x3e5   : > { %v1023_v27 = vmul.f32 %v1577_v25, %v1019_v16 }
 0x3e6   : > { %v1026_v32 = vsub.f32 2.0, %v1024_v26 }
 0x3e7   : > { %v1025_v23 = vsub.f32 2.0, %v1023_v27 }
 0x3e8   : > { %v1028_v31 = vmul.f32 %v1575_v24, %v1026_v32 }
 0x3e9   : > { %v1027_v34 = vmul.f32 %v1577_v25, %v1025_v23 }
 0x3ea   : > { %v1030_v36 = vmul.f32 %v1028_v31, %v1004_v33 }
 0x3eb   : > { %v1029_v35 = vmul.f32 %v1027_v34, %v1003_v28 }
 0x3ec   : > { %v1032_v42 = vadd.f32 1.0, %v1030_v36 }
 0x3ed   : > { %v1031_v39 = vadd.f32 1.0, %v1029_v35 }
 0x3ee   : > { %v1034_v47 = vmul.f32 %v1032_v42, %v970_v46 }
 0x3ef   : > { %v1033_v41 = vmul.f32 %v1031_v39, %v969_v38 }
 0x3f1   : > { %1144 = vmatmul.mubr.f32.vlgmr.msra.gmra.mxu1 %v1033_v41 }
 0x3f2   : > { %1149 = vmatprep.mubr.f32.mxu1 %v1765_v37 }
 0x3f5   : > { %1150 = vmatmul.mubr.f32.gmra.mxu1 %v1034_v47 }
 0x4b1   : > { %v1145_v48 = vpop.f32.mrf.mxu1 }
 0x4b2   : > { %v1146_v40 = vadd.f32 %v1145_v48, %v1072_v49 }
 0x4b3   : > { %v1147_v45 = vpop.f32.mrf.mxu1 }
 0x4b4   : > { %1156 = vst [vmem:[%s439_s16] sm:$0xff] %v1146_v40  ;;  %v1148_v37 = vadd.f32 %v1147_v45, %v1076_v52 }
 0x4b5   : > { %v1151_v54 = vpop.f32.mrf.mxu1 }
 0x4b6   : > { %1157 = vst [vmem:[%s439_s16 + $0x8] sm:$0xff] %v1148_v37  ;;  %v1152_v55 = vadd.f32 %v1151_v54, %v1072_v49 }
 0x4b7   : > { %v1153_v56 = vpop.f32.mrf.mxu1 }
 0x4b8   : > { %1158 = vst [vmem:[%s439_s16 + $0x10] sm:$0xff] %v1152_v55  ;;  %v1154_v57 = vadd.f32 %v1153_v56, %v1076_v52 }
 0x4ba   : > { %1159 = vst [vmem:[%s439_s16 + $0x18] sm:$0xff] %v1154_v57 }
 0x4bb   : > { %1695 = shalt.err (!%p1692_p8)
}
 0x4bc   : > { %s1696_s30 = scalar_lea.hbm %s1981_s29, 512  ;;  %s1700_s12 = scalar_lea.hbm %s2034_s11, 1536 }
 0x4bd   : > { %p1697_p13 = scmp.ne.s32.totalorder %s1981_s29, %s1696_s30  ;;  %p1701_p6 = scmp.lt.s32.totalorder %s1981_s29, %s2034_s11 }
 0x4be   : > { %p1702_p12 = scmp.lt.s32.totalorder %s1700_s12, %s1696_s30 }
 0x4bf   : > { %p1698_p11 = pnand %p1697_p13, %p2050_p1 }
 0x4c0   : > { %p1703_p10 = por %p1702_p12, %p1701_p6 }
 0x4c1   : > { %p1699_p0 = pneg %p1698_p11 }
 0x4c3   : > { %p1704_p9 = pnand %p1703_p10, %p1699_p0 }
 0x4c5   : > { %1707 = shalt.err (!%p1704_p9)
}
 0x4c6   : > { %s1767_s25 = smov 256   ;;  %s1768_s21 = smov 16  }
 0x4c7   : > { %1489 = dma.vmem_to_hbm [thread:$0]  (%p2050_p1), %s1976_s24, 512, %s1981_s29, %s1983_s13, %s1767_s25, %s1767_s25, %s1768_s21  }
 0x4c8 PF: > { %p1516_p3 = scmp.ge.s32.totalorder %s1754_s20, 2  ;;  %s1190_s14 = sand.u32 1, %s1742_s17  }
 0x4c9   : > { %p2051_p2 = scmp.ne.s32.totalorder %s2041_s28, 0  ;;  %s1191_s19 = scalar_lea.sflag [#allocation4], %s1190_s14 }
 0x4cb   : > { %p1505_p4 = pnand %p1516_p3, %p2051_p2 }
 0x4cd   : > { %p1506_p5 = pneg %p1505_p4 }
 0x4cf   : > { %1737 = dma.done.wait (%p1506_p5), %s1191_s19, 512  }
 0x4d0   : > { %1739 = vsyncadd (%p1506_p5), %s1191_s19, 4294966784  ;;  %s2052_s30 = sld [smem:[#allocation15_spill]]  ;;  %p24_p7 = scmp.ge.s32.totalorder %s1854_s23, 5  }
 0x4d1   : > { %s2053_s19 = sld [smem:[#allocation16_spill]]  ;;  %s2054_s17 = smov %s1746_s18 }
 0x4d2   : > { %s2056_s20 = smov %s1854_s23  ;;  %26 = sbr.rel (!%p24_p7) target bundleno = 6 (0x6), region = 116 }
 0x4d6   : > { %s2055_s18 = smov %s2052_s30 }
 0x4d7   :  { %1196 = vsyncpa [#allocation3], 1 }
 0x4d8   :  { %1198 = vsyncpa [#allocation3 + $0x1], 1 }
 0x4d9   :  { %1199 = vsyncpa [#allocation6], 1 }
 0x4da   :  { %1200 = vsyncpa [#allocation9], 1 }
 0x4db   :  { %1201 = vsyncpa [#allocation4], 1 }
 0x4dc   :  { %1203 = vsyncpa [#allocation4 + $0x1], 1 }

</bundles_post_ra>
